<compile_context>
chip_gen: v7x
topology: tpu7x:2x2x1
jax: 0.10.0
libtpu: 0.0.40
codegen_flags: <defaults>
</compile_context>

<pallas_src>
import functools

import jax
import jax.numpy as jnp
from jax.experimental import pallas as pl
from jax.experimental.pallas import tpu as pltpu

EPS = 1e-5      # PyTorch BatchNorm1d default eps
_KS = 3         # conv kernel size


# ----------------------------------------------------------------------------
# helpers
# ----------------------------------------------------------------------------
def _pad128(d):
    return ((d + 127) // 128) * 128


def _resident_spec(shape):
    """Full-array block with a constant index map -> loaded once, VMEM-resident."""
    nd = len(shape)
    return pl.BlockSpec(shape, lambda n, _nd=nd: (0,) * _nd)


# ----------------------------------------------------------------------------
# fused kernel: encoder (per grid step) + Projection/Predictor MLPs (last step)
# ----------------------------------------------------------------------------
def _simsiam_kernel(H, W,
                    xw_ref, encw_ref, encb_ref,
                    pw1_ref, pg1_ref, pbe1_ref,
                    pw2_ref, pg2_ref, pbe2_ref,
                    pw3_ref, pg3_ref, pbe3_ref,
                    qw1_ref, qg1_ref, qbe1_ref,
                    qw2_ref, qb2_ref,
                    e_ref, z_ref, p_ref):
    i = pl.program_id(0)
    n_img = pl.num_programs(0)

    @pl.when(i == 0)
    def _init():
        e_ref[...] = jnp.zeros_like(e_ref)
        z_ref[...] = jnp.zeros_like(z_ref)
        p_ref[...] = jnp.zeros_like(p_ref)

    # ---- encoder for image i: 3x3 'same' conv as 9 accumulating K=C matmuls.
    # xw_ref block: (1, 3, (H+2)*W, C).  Copy kw holds rows r = hp*W + w with
    # value x_pad[i, hp, w + kw, c], so tap (kh, kw) is the aligned static row
    # slice [kh*W, (kh+H)*W) of that copy (offsets are multiples of W=16).
    xt = xw_ref[0]                                        # (3, (H+2)*W, C) bf16
    f_pad = encb_ref.shape[1]
    acc = jnp.zeros((H * W, f_pad), jnp.float32)
    for kh in range(_KS):
        for kw in range(_KS):
            win = xt[kw, kh * W:(kh + H) * W, :]          # (H*W, C) bf16
            acc = acc + jnp.dot(win, encw_ref[kh * _KS + kw],
                                preferred_element_type=jnp.float32)
    y = jnp.maximum(acc + encb_ref[...], 0.0)             # bias + ReLU (f32)
    e_row = jnp.mean(y, axis=0, keepdims=True)            # global average pool
    e_ref[pl.ds(i, 1), :] = e_row                         # e stays VMEM resident

    # ---- last image: fused ProjectionMLP + PredictorMLP on the full batch.
    # BatchNorm needs the whole batch, so this tail runs exactly once.
    @pl.when(i == n_img - 1)
    def _mlps():
        inv_n = 1.0 / e_ref.shape[0]

        def lin(h, w_ref):                                # bf16 MXU, f32 acc
            return jnp.dot(h.astype(jnp.bfloat16), w_ref[...],
                           preferred_element_type=jnp.float32)

        def bn(h, g_ref, be_ref, relu):                   # one-pass batch stats
            mu = jnp.sum(h, axis=0, keepdims=True) * inv_n
            var = jnp.sum(h * h, axis=0, keepdims=True) * inv_n - mu * mu
            var = jnp.maximum(var, 0.0)
            out = (h - mu) * jax.lax.rsqrt(var + EPS) * g_ref[...] + be_ref[...]
            return jnp.maximum(out, 0.0) if relu else out

        e_all = e_ref[...]                                # (N, F_pad) f32
        # ProjectionMLP: Lin -> BN -> ReLU -> Lin -> BN -> ReLU -> Lin -> BN
        h = bn(lin(e_all, pw1_ref), pg1_ref, pbe1_ref, True)
        h = bn(lin(h, pw2_ref), pg2_ref, pbe2_ref, True)
        z = bn(lin(h, pw3_ref), pg3_ref, pbe3_ref, False)
        z_ref[...] = z
        # PredictorMLP: Lin -> BN -> ReLU -> Lin
        h2 = bn(lin(z, qw1_ref), qg1_ref, qbe1_ref, True)
        p_ref[...] = lin(h2, qw2_ref) + qb2_ref[...]


# ----------------------------------------------------------------------------
# wrapper
# ----------------------------------------------------------------------------
def simsiam_fused(params, x):
    """One fused pallas_call.  Returns (e, z, p) sliced to their true widths."""
    N, C, H, W = x.shape
    dims = params["dims"]
    f_pad = params["enc_b"].shape[1]
    l_pad = params["pj_g3"].shape[1]

    # NCHW -> NHWC, 'same' pad, then pre-shift along W (3 copies) so the kernel
    # can extract every conv tap with an aligned static slice.  This is ~3x the
    # input bytes in bf16 (vs the previous 9x f32 HBM im2col slab).
    x_nhwc = jnp.transpose(x, (0, 2, 3, 1))
    x_pad = jnp.pad(x_nhwc, ((0, 0), (1, 1), (1, 1), (0, 0)))
    xw = jnp.stack(
        [x_pad[:, :, kw:kw + W, :].reshape(N, (H + 2) * W, C) for kw in range(3)],
        axis=1).astype(jnp.bfloat16)                       # (N, 3, (H+2)*W, C)

    xw_spec = pl.BlockSpec((1, 3, (H + 2) * W, C), lambda n: (n, 0, 0, 0))

    param_order = ["enc_w", "enc_b",
                   "pj_w1", "pj_g1", "pj_be1",
                   "pj_w2", "pj_g2", "pj_be2",
                   "pj_w3", "pj_g3", "pj_be3",
                   "pd_w1", "pd_g1", "pd_be1",
                   "pd_w2", "pd_b2"]
    param_vals = [params[k] for k in param_order]
    in_specs = [xw_spec] + [_resident_spec(v.shape) for v in param_vals]

    out_shape = (jax.ShapeDtypeStruct((N, f_pad), jnp.float32),
                 jax.ShapeDtypeStruct((N, l_pad), jnp.float32),
                 jax.ShapeDtypeStruct((N, l_pad), jnp.float32))
    out_specs = [_resident_spec((N, f_pad)),
                 _resident_spec((N, l_pad)),
                 _resident_spec((N, l_pad))]

    kernel = functools.partial(_simsiam_kernel, H, W)
    e_pad, z_pad, p_pad = pl.pallas_call(
        kernel,
        out_shape=out_shape,
        grid_spec=pltpu.PrefetchScalarGridSpec(
            num_scalar_prefetch=0,
            grid=(N,),
            in_specs=in_specs,
            out_specs=out_specs,
        ),
        compiler_params=pltpu.CompilerParams(
            # The grid axis is reduction-like: the fused BN/MLP tail on the
            # final step consumes every previously written row of e, so it must
            # stay "arbitrary".  The per-image conv input is still
            # double-buffered by Pallas.  48 MiB leaves headroom on v7x's
            # 64 MiB per-core VMEM.
            dimension_semantics=("arbitrary",),
            vmem_limit_bytes=48 * 1024 * 1024,
        ),
    )(xw, *param_vals)

    e = e_pad[:, :dims["outsize"]]
    z = z_pad[:, :dims["latent"]]
    p = p_pad[:, :dims["latent"]]
    return e, z, p


def simsiam_forward(params, x):
    # SimSiam.forward(x) == self.encode(x)
    return simsiam_fused(params, x)[0]


# ----------------------------------------------------------------------------
# deterministic parameter construction (zero-padded to 128-lane feature dims)
# ----------------------------------------------------------------------------
def init_params(key, in_ch, outsize, proj_hidden, latent, pred_hidden):
    f32, bf16 = jnp.float32, jnp.bfloat16
    f_pad, ph_pad = _pad128(outsize), _pad128(proj_hidden)
    l_pad, dh_pad = _pad128(latent), _pad128(pred_hidden)
    ks = jax.random.split(key, 6)

    def linw(k, din, dout, pin, pout):
        w = jax.random.normal(k, (din, dout), f32) * 0.05
        return jnp.pad(w, ((0, pin - din), (0, pout - dout))).astype(bf16)

    def bnp(d, dpad):                      # gamma=1, beta=0 on the real columns
        g = jnp.pad(jnp.ones((1, d), f32), ((0, 0), (0, dpad - d)))
        return g, jnp.zeros((1, dpad), f32)

    # encoder: 3x3 conv weights stored per tap: (9, C, F_pad)
    enc_w = jax.random.normal(ks[0], (9, in_ch, outsize), f32) * 0.05
    enc_w = jnp.pad(enc_w, ((0, 0), (0, 0), (0, f_pad - outsize))).astype(bf16)
    enc_b = jnp.zeros((1, f_pad), f32)

    # Linear biases immediately followed by BatchNorm are dropped (BN's mean
    # subtraction cancels them exactly -> same math, less traffic).
    pj_w1 = linw(ks[1], outsize, proj_hidden, f_pad, ph_pad)
    pj_g1, pj_be1 = bnp(proj_hidden, ph_pad)
    pj_w2 = linw(ks[2], proj_hidden, proj_hidden, ph_pad, ph_pad)
    pj_g2, pj_be2 = bnp(proj_hidden, ph_pad)
    pj_w3 = linw(ks[3], proj_hidden, latent, ph_pad, l_pad)
    pj_g3, pj_be3 = bnp(latent, l_pad)

    pd_w1 = linw(ks[4], latent, pred_hidden, l_pad, dh_pad)
    pd_g1, pd_be1 = bnp(pred_hidden, dh_pad)
    pd_w2 = linw(ks[5], pred_hidden, latent, dh_pad, l_pad)
    pd_b2 = jnp.zeros((1, l_pad), f32)

    return dict(
        dims=dict(outsize=outsize, latent=latent),
        enc_w=enc_w, enc_b=enc_b,
        pj_w1=pj_w1, pj_g1=pj_g1, pj_be1=pj_be1,
        pj_w2=pj_w2, pj_g2=pj_g2, pj_be2=pj_be2,
        pj_w3=pj_w3, pj_g3=pj_g3, pj_be3=pj_be3,
        pd_w1=pd_w1, pd_g1=pd_g1, pd_be1=pd_be1,
        pd_w2=pd_w2, pd_b2=pd_b2)


# ----------------------------------------------------------------------------
if __name__ == "__main__":
    key = jax.random.PRNGKey(0)
    k_x, k_p = jax.random.split(key)

    N, C, H, W = 2, 4, 16, 16              # small synthetic NCHW input
    OUTSIZE, PROJ_HIDDEN, LATENT, PRED_HIDDEN = 32, 64, 32, 64

    x = jax.random.normal(k_x, (N, C, H, W), jnp.float32)
    params = init_params(k_p, C, OUTSIZE, PROJ_HIDDEN, LATENT, PRED_HIDDEN)

    # SimSiam.forward(x) == encode(x) == e; z / p are the project / predict
    # hot paths, all produced by the single fused kernel call.
    e, z, p = simsiam_fused(params, x)
    jax.block_until_ready((e, z, p))

    assert e.shape == (N, OUTSIZE) and z.shape == (N, LATENT) and p.shape == (N, LATENT)
    assert bool(jnp.all(jnp.isfinite(e)) & jnp.all(jnp.isfinite(z)) & jnp.all(jnp.isfinite(p)))
    print("KERNEL_OK")
</pallas_src>

<mosaic_0001>
module attributes {stable_mosaic.version = 11 : i64} {
  func.func @_simsiam_kernel(%arg0: i32, %arg1: memref<1x3x288x4xbf16, #tpu.memory_space<vmem>>, %arg2: memref<9x4x128xbf16, #tpu.memory_space<vmem>>, %arg3: memref<1x128xf32, #tpu.memory_space<vmem>>, %arg4: memref<128x128xbf16, #tpu.memory_space<vmem>>, %arg5: memref<1x128xf32, #tpu.memory_space<vmem>>, %arg6: memref<1x128xf32, #tpu.memory_space<vmem>>, %arg7: memref<128x128xbf16, #tpu.memory_space<vmem>>, %arg8: memref<1x128xf32, #tpu.memory_space<vmem>>, %arg9: memref<1x128xf32, #tpu.memory_space<vmem>>, %arg10: memref<128x128xbf16, #tpu.memory_space<vmem>>, %arg11: memref<1x128xf32, #tpu.memory_space<vmem>>, %arg12: memref<1x128xf32, #tpu.memory_space<vmem>>, %arg13: memref<128x128xbf16, #tpu.memory_space<vmem>>, %arg14: memref<1x128xf32, #tpu.memory_space<vmem>>, %arg15: memref<1x128xf32, #tpu.memory_space<vmem>>, %arg16: memref<128x128xbf16, #tpu.memory_space<vmem>>, %arg17: memref<1x128xf32, #tpu.memory_space<vmem>>, %arg18: memref<2x128xf32, #tpu.memory_space<vmem>>, %arg19: memref<2x128xf32, #tpu.memory_space<vmem>>, %arg20: memref<2x128xf32, #tpu.memory_space<vmem>>) attributes {dimension_semantics = [#tpu.dimension_semantics<arbitrary>], iteration_bounds = array<i64: 2>, scalar_prefetch = 0 : i64, scratch_operands = 0 : i64, tpu.core_type = #tpu.core_type<tc>, window_params = [{transform_indices = @transform_0, window_bounds = array<i64: 1, 3, 288, 4>}, {pipeline_mode = #tpu.pipeline_mode<synchronous>, transform_indices = @transform_1, window_bounds = array<i64: 9, 4, 128>}, {pipeline_mode = #tpu.pipeline_mode<synchronous>, transform_indices = @transform_2, window_bounds = array<i64: 1, 128>}, {pipeline_mode = #tpu.pipeline_mode<synchronous>, transform_indices = @transform_3, window_bounds = array<i64: 128, 128>}, {pipeline_mode = #tpu.pipeline_mode<synchronous>, transform_indices = @transform_4, window_bounds = array<i64: 1, 128>}, {pipeline_mode = #tpu.pipeline_mode<synchronous>, transform_indices = @transform_5, window_bounds = array<i64: 1, 128>}, {pipeline_mode = #tpu.pipeline_mode<synchronous>, transform_indices = @transform_6, window_bounds = array<i64: 128, 128>}, {pipeline_mode = #tpu.pipeline_mode<synchronous>, transform_indices = @transform_7, window_bounds = array<i64: 1, 128>}, {pipeline_mode = #tpu.pipeline_mode<synchronous>, transform_indices = @transform_8, window_bounds = array<i64: 1, 128>}, {pipeline_mode = #tpu.pipeline_mode<synchronous>, transform_indices = @transform_9, window_bounds = array<i64: 128, 128>}, {pipeline_mode = #tpu.pipeline_mode<synchronous>, transform_indices = @transform_10, window_bounds = array<i64: 1, 128>}, {pipeline_mode = #tpu.pipeline_mode<synchronous>, transform_indices = @transform_11, window_bounds = array<i64: 1, 128>}, {pipeline_mode = #tpu.pipeline_mode<synchronous>, transform_indices = @transform_12, window_bounds = array<i64: 128, 128>}, {pipeline_mode = #tpu.pipeline_mode<synchronous>, transform_indices = @transform_13, window_bounds = array<i64: 1, 128>}, {pipeline_mode = #tpu.pipeline_mode<synchronous>, transform_indices = @transform_14, window_bounds = array<i64: 1, 128>}, {pipeline_mode = #tpu.pipeline_mode<synchronous>, transform_indices = @transform_15, window_bounds = array<i64: 128, 128>}, {pipeline_mode = #tpu.pipeline_mode<synchronous>, transform_indices = @transform_16, window_bounds = array<i64: 1, 128>}, {pipeline_mode = #tpu.pipeline_mode<synchronous>, transform_indices = @transform_17, window_bounds = array<i64: 2, 128>}, {pipeline_mode = #tpu.pipeline_mode<synchronous>, transform_indices = @transform_18, window_bounds = array<i64: 2, 128>}, {pipeline_mode = #tpu.pipeline_mode<synchronous>, transform_indices = @transform_19, window_bounds = array<i64: 2, 128>}]} {
    %c0_i32 = arith.constant 0 : i32
    %0 = arith.cmpi eq, %arg0, %c0_i32 : i32
    %1 = arith.extui %0 : i1 to i32
    %c0_i32_0 = arith.constant 0 : i32
    %2 = arith.cmpi ne, %1, %c0_i32_0 : i32
    scf.if %2 {
      %cst_39 = arith.constant 0.000000e+00 : f32
      %74 = vector.broadcast %cst_39 : f32 to vector<2x128xf32>
      %c0_40 = arith.constant 0 : index
      %c0_41 = arith.constant 0 : index
      %75 = vector.load %arg18[%c0_40, %c0_41] : memref<2x128xf32, #tpu.memory_space<vmem>>, vector<2x128xf32>
      tpu.vector_store %arg18[%c0_40, %c0_41], %74 {strides = array<i32>} : memref<2x128xf32, #tpu.memory_space<vmem>>, vector<2x128xf32>,
      %cst_42 = arith.constant 0.000000e+00 : f32
      %76 = vector.broadcast %cst_42 : f32 to vector<2x128xf32>
      %c0_43 = arith.constant 0 : index
      %c0_44 = arith.constant 0 : index
      %77 = vector.load %arg19[%c0_43, %c0_44] : memref<2x128xf32, #tpu.memory_space<vmem>>, vector<2x128xf32>
      tpu.vector_store %arg19[%c0_43, %c0_44], %76 {strides = array<i32>} : memref<2x128xf32, #tpu.memory_space<vmem>>, vector<2x128xf32>,
      %cst_45 = arith.constant 0.000000e+00 : f32
      %78 = vector.broadcast %cst_45 : f32 to vector<2x128xf32>
      %c0_46 = arith.constant 0 : index
      %c0_47 = arith.constant 0 : index
      %79 = vector.load %arg20[%c0_46, %c0_47] : memref<2x128xf32, #tpu.memory_space<vmem>>, vector<2x128xf32>
      tpu.vector_store %arg20[%c0_46, %c0_47], %78 {strides = array<i32>} : memref<2x128xf32, #tpu.memory_space<vmem>>, vector<2x128xf32>,
    } else {
    }
    %c0 = arith.constant 0 : index
    %c0_1 = arith.constant 0 : index
    %c0_2 = arith.constant 0 : index
    %c0_3 = arith.constant 0 : index
    %3 = vector.load %arg1[%c0, %c0_1, %c0_2, %c0_3] : memref<1x3x288x4xbf16, #tpu.memory_space<vmem>>, vector<1x3x288x4xbf16>
    %4 = vector.shape_cast %3 : vector<1x3x288x4xbf16> to vector<3x288x4xbf16>
    %cst = arith.constant 0.000000e+00 : f32
    %5 = vector.broadcast %cst : f32 to vector<256x128xf32>
    %6 = vector.extract_strided_slice %4 {offsets = [0, 0, 0], sizes = [1, 256, 4], strides = [1, 1, 1]} : vector<3x288x4xbf16> to vector<1x256x4xbf16>
    %7 = vector.shape_cast %6 : vector<1x256x4xbf16> to vector<256x4xbf16>
    %c0_4 = arith.constant 0 : index
    %c0_5 = arith.constant 0 : index
    %c0_6 = arith.constant 0 : index
    %8 = vector.load %arg2[%c0_4, %c0_5, %c0_6] : memref<9x4x128xbf16, #tpu.memory_space<vmem>>, vector<1x4x128xbf16>
    %9 = vector.shape_cast %8 : vector<1x4x128xbf16> to vector<4x128xbf16>
    %cst_7 = arith.constant dense<0.000000e+00> : vector<256x128xf32>
    %10 = tpu.matmul %7, %9, %cst_7 {dimension_numbers = #tpu.dot_dimension_numbers<[1], [0], [0], [1], [0, 0, 1, 1], [], []>} : vector<256x4xbf16>, vector<4x128xbf16>, vector<256x128xf32> -> vector<256x128xf32>
    %11 = arith.addf %5, %10 : vector<256x128xf32>
    %12 = vector.extract_strided_slice %4 {offsets = [1, 0, 0], sizes = [1, 256, 4], strides = [1, 1, 1]} : vector<3x288x4xbf16> to vector<1x256x4xbf16>
    %13 = vector.shape_cast %12 : vector<1x256x4xbf16> to vector<256x4xbf16>
    %c1 = arith.constant 1 : index
    %c0_8 = arith.constant 0 : index
    %c0_9 = arith.constant 0 : index
    %14 = vector.load %arg2[%c1, %c0_8, %c0_9] : memref<9x4x128xbf16, #tpu.memory_space<vmem>>, vector<1x4x128xbf16>
    %15 = vector.shape_cast %14 : vector<1x4x128xbf16> to vector<4x128xbf16>
    %cst_10 = arith.constant dense<0.000000e+00> : vector<256x128xf32>
    %16 = tpu.matmul %13, %15, %cst_10 {dimension_numbers = #tpu.dot_dimension_numbers<[1], [0], [0], [1], [0, 0, 1, 1], [], []>} : vector<256x4xbf16>, vector<4x128xbf16>, vector<256x128xf32> -> vector<256x128xf32>
    %17 = arith.addf %11, %16 : vector<256x128xf32>
    %18 = vector.extract_strided_slice %4 {offsets = [2, 0, 0], sizes = [1, 256, 4], strides = [1, 1, 1]} : vector<3x288x4xbf16> to vector<1x256x4xbf16>
    %19 = vector.shape_cast %18 : vector<1x256x4xbf16> to vector<256x4xbf16>
    %c2 = arith.constant 2 : index
    %c0_11 = arith.constant 0 : index
    %c0_12 = arith.constant 0 : index
    %20 = vector.load %arg2[%c2, %c0_11, %c0_12] : memref<9x4x128xbf16, #tpu.memory_space<vmem>>, vector<1x4x128xbf16>
    %21 = vector.shape_cast %20 : vector<1x4x128xbf16> to vector<4x128xbf16>
    %cst_13 = arith.constant dense<0.000000e+00> : vector<256x128xf32>
    %22 = tpu.matmul %19, %21, %cst_13 {dimension_numbers = #tpu.dot_dimension_numbers<[1], [0], [0], [1], [0, 0, 1, 1], [], []>} : vector<256x4xbf16>, vector<4x128xbf16>, vector<256x128xf32> -> vector<256x128xf32>
    %23 = arith.addf %17, %22 : vector<256x128xf32>
    %24 = vector.extract_strided_slice %4 {offsets = [0, 16, 0], sizes = [1, 256, 4], strides = [1, 1, 1]} : vector<3x288x4xbf16> to vector<1x256x4xbf16>
    %25 = vector.shape_cast %24 : vector<1x256x4xbf16> to vector<256x4xbf16>
    %c3 = arith.constant 3 : index
    %c0_14 = arith.constant 0 : index
    %c0_15 = arith.constant 0 : index
    %26 = vector.load %arg2[%c3, %c0_14, %c0_15] : memref<9x4x128xbf16, #tpu.memory_space<vmem>>, vector<1x4x128xbf16>
    %27 = vector.shape_cast %26 : vector<1x4x128xbf16> to vector<4x128xbf16>
    %cst_16 = arith.constant dense<0.000000e+00> : vector<256x128xf32>
    %28 = tpu.matmul %25, %27, %cst_16 {dimension_numbers = #tpu.dot_dimension_numbers<[1], [0], [0], [1], [0, 0, 1, 1], [], []>} : vector<256x4xbf16>, vector<4x128xbf16>, vector<256x128xf32> -> vector<256x128xf32>
    %29 = arith.addf %23, %28 : vector<256x128xf32>
    %30 = vector.extract_strided_slice %4 {offsets = [1, 16, 0], sizes = [1, 256, 4], strides = [1, 1, 1]} : vector<3x288x4xbf16> to vector<1x256x4xbf16>
    %31 = vector.shape_cast %30 : vector<1x256x4xbf16> to vector<256x4xbf16>
    %c4 = arith.constant 4 : index
    %c0_17 = arith.constant 0 : index
    %c0_18 = arith.constant 0 : index
    %32 = vector.load %arg2[%c4, %c0_17, %c0_18] : memref<9x4x128xbf16, #tpu.memory_space<vmem>>, vector<1x4x128xbf16>
    %33 = vector.shape_cast %32 : vector<1x4x128xbf16> to vector<4x128xbf16>
    %cst_19 = arith.constant dense<0.000000e+00> : vector<256x128xf32>
    %34 = tpu.matmul %31, %33, %cst_19 {dimension_numbers = #tpu.dot_dimension_numbers<[1], [0], [0], [1], [0, 0, 1, 1], [], []>} : vector<256x4xbf16>, vector<4x128xbf16>, vector<256x128xf32> -> vector<256x128xf32>
    %35 = arith.addf %29, %34 : vector<256x128xf32>
    %36 = vector.extract_strided_slice %4 {offsets = [2, 16, 0], sizes = [1, 256, 4], strides = [1, 1, 1]} : vector<3x288x4xbf16> to vector<1x256x4xbf16>
    %37 = vector.shape_cast %36 : vector<1x256x4xbf16> to vector<256x4xbf16>
    %c5 = arith.constant 5 : index
    %c0_20 = arith.constant 0 : index
    %c0_21 = arith.constant 0 : index
    %38 = vector.load %arg2[%c5, %c0_20, %c0_21] : memref<9x4x128xbf16, #tpu.memory_space<vmem>>, vector<1x4x128xbf16>
    %39 = vector.shape_cast %38 : vector<1x4x128xbf16> to vector<4x128xbf16>
    %cst_22 = arith.constant dense<0.000000e+00> : vector<256x128xf32>
    %40 = tpu.matmul %37, %39, %cst_22 {dimension_numbers = #tpu.dot_dimension_numbers<[1], [0], [0], [1], [0, 0, 1, 1], [], []>} : vector<256x4xbf16>, vector<4x128xbf16>, vector<256x128xf32> -> vector<256x128xf32>
    %41 = arith.addf %35, %40 : vector<256x128xf32>
    %42 = vector.extract_strided_slice %4 {offsets = [0, 32, 0], sizes = [1, 256, 4], strides = [1, 1, 1]} : vector<3x288x4xbf16> to vector<1x256x4xbf16>
    %43 = vector.shape_cast %42 : vector<1x256x4xbf16> to vector<256x4xbf16>
    %c6 = arith.constant 6 : index
    %c0_23 = arith.constant 0 : index
    %c0_24 = arith.constant 0 : index
    %44 = vector.load %arg2[%c6, %c0_23, %c0_24] : memref<9x4x128xbf16, #tpu.memory_space<vmem>>, vector<1x4x128xbf16>
    %45 = vector.shape_cast %44 : vector<1x4x128xbf16> to vector<4x128xbf16>
    %cst_25 = arith.constant dense<0.000000e+00> : vector<256x128xf32>
    %46 = tpu.matmul %43, %45, %cst_25 {dimension_numbers = #tpu.dot_dimension_numbers<[1], [0], [0], [1], [0, 0, 1, 1], [], []>} : vector<256x4xbf16>, vector<4x128xbf16>, vector<256x128xf32> -> vector<256x128xf32>
    %47 = arith.addf %41, %46 : vector<256x128xf32>
    %48 = vector.extract_strided_slice %4 {offsets = [1, 32, 0], sizes = [1, 256, 4], strides = [1, 1, 1]} : vector<3x288x4xbf16> to vector<1x256x4xbf16>
    %49 = vector.shape_cast %48 : vector<1x256x4xbf16> to vector<256x4xbf16>
    %c7 = arith.constant 7 : index
    %c0_26 = arith.constant 0 : index
    %c0_27 = arith.constant 0 : index
    %50 = vector.load %arg2[%c7, %c0_26, %c0_27] : memref<9x4x128xbf16, #tpu.memory_space<vmem>>, vector<1x4x128xbf16>
    %51 = vector.shape_cast %50 : vector<1x4x128xbf16> to vector<4x128xbf16>
    %cst_28 = arith.constant dense<0.000000e+00> : vector<256x128xf32>
    %52 = tpu.matmul %49, %51, %cst_28 {dimension_numbers = #tpu.dot_dimension_numbers<[1], [0], [0], [1], [0, 0, 1, 1], [], []>} : vector<256x4xbf16>, vector<4x128xbf16>, vector<256x128xf32> -> vector<256x128xf32>
    %53 = arith.addf %47, %52 : vector<256x128xf32>
    %54 = vector.extract_strided_slice %4 {offsets = [2, 32, 0], sizes = [1, 256, 4], strides = [1, 1, 1]} : vector<3x288x4xbf16> to vector<1x256x4xbf16>
    %55 = vector.shape_cast %54 : vector<1x256x4xbf16> to vector<256x4xbf16>
    %c8 = arith.constant 8 : index
    %c0_29 = arith.constant 0 : index
    %c0_30 = arith.constant 0 : index
    %56 = vector.load %arg2[%c8, %c0_29, %c0_30] : memref<9x4x128xbf16, #tpu.memory_space<vmem>>, vector<1x4x128xbf16>
    %57 = vector.shape_cast %56 : vector<1x4x128xbf16> to vector<4x128xbf16>
    %cst_31 = arith.constant dense<0.000000e+00> : vector<256x128xf32>
    %58 = tpu.matmul %55, %57, %cst_31 {dimension_numbers = #tpu.dot_dimension_numbers<[1], [0], [0], [1], [0, 0, 1, 1], [], []>} : vector<256x4xbf16>, vector<4x128xbf16>, vector<256x128xf32> -> vector<256x128xf32>
    %59 = arith.addf %53, %58 : vector<256x128xf32>
    %c0_32 = arith.constant 0 : index
    %c0_33 = arith.constant 0 : index
    %60 = vector.load %arg3[%c0_32, %c0_33] : memref<1x128xf32, #tpu.memory_space<vmem>>, vector<1x128xf32>
    %61 = vector.broadcast %60 : vector<1x128xf32> to vector<256x128xf32>
    %62 = arith.addf %59, %61 : vector<256x128xf32>
    %cst_34 = arith.constant 0.000000e+00 : f32
    %63 = vector.broadcast %cst_34 : f32 to vector<256x128xf32>
    %64 = arith.maximumf %62, %63 : vector<256x128xf32>
    %cst_35 = arith.constant dense<0.000000e+00> : vector<128xf32>
    %65 = vector.multi_reduction <add>, %64, %cst_35 [0] : vector<256x128xf32> to vector<128xf32>
    %66 = vector.shape_cast %65 : vector<128xf32> to vector<1x128xf32>
    %cst_36 = arith.constant 2.560000e+02 : f32
    %67 = vector.broadcast %cst_36 : f32 to vector<1x128xf32>
    %68 = arith.divf %66, %67 : vector<1x128xf32>
    %69 = arith.index_cast %arg0 : i32 to index
    %c0_37 = arith.constant 0 : index
    %70 = vector.load %arg18[%69, %c0_37] : memref<2x128xf32, #tpu.memory_space<vmem>>, vector<1x128xf32>
    tpu.vector_store %arg18[%69, %c0_37], %68 {strides = array<i32>} : memref<2x128xf32, #tpu.memory_space<vmem>>, vector<1x128xf32>,
    %c1_i32 = arith.constant 1 : i32
    %71 = arith.cmpi eq, %arg0, %c1_i32 : i32
    %72 = arith.extui %71 : i1 to i32
    %c0_i32_38 = arith.constant 0 : i32
    %73 = arith.cmpi ne, %72, %c0_i32_38 : i32
    scf.if %73 {
      %c0_39 = arith.constant 0 : index
      %c0_40 = arith.constant 0 : index
      %74 = vector.load %arg18[%c0_39, %c0_40] : memref<2x128xf32, #tpu.memory_space<vmem>>, vector<2x128xf32>
      %75 = arith.truncf %74 : vector<2x128xf32> to vector<2x128xbf16>
      %c0_41 = arith.constant 0 : index
      %c0_42 = arith.constant 0 : index
      %76 = vector.load %arg4[%c0_41, %c0_42] : memref<128x128xbf16, #tpu.memory_space<vmem>>, vector<128x128xbf16>
      %cst_43 = arith.constant dense<0.000000e+00> : vector<2x128xf32>
      %77 = tpu.matmul %75, %76, %cst_43 {dimension_numbers = #tpu.dot_dimension_numbers<[1], [0], [0], [1], [0, 0, 1, 1], [], []>} : vector<2x128xbf16>, vector<128x128xbf16>, vector<2x128xf32> -> vector<2x128xf32>
      %cst_44 = arith.constant dense<0.000000e+00> : vector<128xf32>
      %78 = vector.multi_reduction <add>, %77, %cst_44 [0] : vector<2x128xf32> to vector<128xf32>
      %79 = vector.shape_cast %78 : vector<128xf32> to vector<1x128xf32>
      %cst_45 = arith.constant 5.000000e-01 : f32
      %80 = vector.broadcast %cst_45 : f32 to vector<1x128xf32>
      %81 = arith.mulf %79, %80 : vector<1x128xf32>
      %82 = arith.mulf %77, %77 : vector<2x128xf32>
      %cst_46 = arith.constant dense<0.000000e+00> : vector<128xf32>
      %83 = vector.multi_reduction <add>, %82, %cst_46 [0] : vector<2x128xf32> to vector<128xf32>
      %84 = vector.shape_cast %83 : vector<128xf32> to vector<1x128xf32>
      %cst_47 = arith.constant 5.000000e-01 : f32
      %85 = vector.broadcast %cst_47 : f32 to vector<1x128xf32>
      %86 = arith.mulf %84, %85 : vector<1x128xf32>
      %87 = arith.mulf %81, %81 : vector<1x128xf32>
      %88 = arith.subf %86, %87 : vector<1x128xf32>
      %cst_48 = arith.constant 0.000000e+00 : f32
      %89 = vector.broadcast %cst_48 : f32 to vector<1x128xf32>
      %90 = arith.maximumf %88, %89 : vector<1x128xf32>
      %91 = vector.broadcast %81 : vector<1x128xf32> to vector<2x128xf32>
      %92 = arith.subf %77, %91 : vector<2x128xf32>
      %cst_49 = arith.constant 9.99999974E-6 : f32
      %93 = vector.broadcast %cst_49 : f32 to vector<1x128xf32>
      %94 = arith.addf %90, %93 : vector<1x128xf32>
      %95 = math.rsqrt %94 : vector<1x128xf32>
      %96 = vector.broadcast %95 : vector<1x128xf32> to vector<2x128xf32>
      %97 = arith.mulf %92, %96 : vector<2x128xf32>
      %c0_50 = arith.constant 0 : index
      %c0_51 = arith.constant 0 : index
      %98 = vector.load %arg5[%c0_50, %c0_51] : memref<1x128xf32, #tpu.memory_space<vmem>>, vector<1x128xf32>
      %99 = vector.broadcast %98 : vector<1x128xf32> to vector<2x128xf32>
      %100 = arith.mulf %97, %99 : vector<2x128xf32>
      %c0_52 = arith.constant 0 : index
      %c0_53 = arith.constant 0 : index
      %101 = vector.load %arg6[%c0_52, %c0_53] : memref<1x128xf32, #tpu.memory_space<vmem>>, vector<1x128xf32>
      %102 = vector.broadcast %101 : vector<1x128xf32> to vector<2x128xf32>
      %103 = arith.addf %100, %102 : vector<2x128xf32>
      %cst_54 = arith.constant 0.000000e+00 : f32
      %104 = vector.broadcast %cst_54 : f32 to vector<2x128xf32>
      %105 = arith.maximumf %103, %104 : vector<2x128xf32>
      %106 = arith.truncf %105 : vector<2x128xf32> to vector<2x128xbf16>
      %c0_55 = arith.constant 0 : index
      %c0_56 = arith.constant 0 : index
      %107 = vector.load %arg7[%c0_55, %c0_56] : memref<128x128xbf16, #tpu.memory_space<vmem>>, vector<128x128xbf16>
      %cst_57 = arith.constant dense<0.000000e+00> : vector<2x128xf32>
      %108 = tpu.matmul %106, %107, %cst_57 {dimension_numbers = #tpu.dot_dimension_numbers<[1], [0], [0], [1], [0, 0, 1, 1], [], []>} : vector<2x128xbf16>, vector<128x128xbf16>, vector<2x128xf32> -> vector<2x128xf32>
      %cst_58 = arith.constant dense<0.000000e+00> : vector<128xf32>
      %109 = vector.multi_reduction <add>, %108, %cst_58 [0] : vector<2x128xf32> to vector<128xf32>
      %110 = vector.shape_cast %109 : vector<128xf32> to vector<1x128xf32>
      %cst_59 = arith.constant 5.000000e-01 : f32
      %111 = vector.broadcast %cst_59 : f32 to vector<1x128xf32>
      %112 = arith.mulf %110, %111 : vector<1x128xf32>
      %113 = arith.mulf %108, %108 : vector<2x128xf32>
      %cst_60 = arith.constant dense<0.000000e+00> : vector<128xf32>
      %114 = vector.multi_reduction <add>, %113, %cst_60 [0] : vector<2x128xf32> to vector<128xf32>
      %115 = vector.shape_cast %114 : vector<128xf32> to vector<1x128xf32>
      %cst_61 = arith.constant 5.000000e-01 : f32
      %116 = vector.broadcast %cst_61 : f32 to vector<1x128xf32>
      %117 = arith.mulf %115, %116 : vector<1x128xf32>
      %118 = arith.mulf %112, %112 : vector<1x128xf32>
      %119 = arith.subf %117, %118 : vector<1x128xf32>
      %cst_62 = arith.constant 0.000000e+00 : f32
      %120 = vector.broadcast %cst_62 : f32 to vector<1x128xf32>
      %121 = arith.maximumf %119, %120 : vector<1x128xf32>
      %122 = vector.broadcast %112 : vector<1x128xf32> to vector<2x128xf32>
      %123 = arith.subf %108, %122 : vector<2x128xf32>
      %cst_63 = arith.constant 9.99999974E-6 : f32
      %124 = vector.broadcast %cst_63 : f32 to vector<1x128xf32>
      %125 = arith.addf %121, %124 : vector<1x128xf32>
      %126 = math.rsqrt %125 : vector<1x128xf32>
      %127 = vector.broadcast %126 : vector<1x128xf32> to vector<2x128xf32>
      %128 = arith.mulf %123, %127 : vector<2x128xf32>
      %c0_64 = arith.constant 0 : index
      %c0_65 = arith.constant 0 : index
      %129 = vector.load %arg8[%c0_64, %c0_65] : memref<1x128xf32, #tpu.memory_space<vmem>>, vector<1x128xf32>
      %130 = vector.broadcast %129 : vector<1x128xf32> to vector<2x128xf32>
      %131 = arith.mulf %128, %130 : vector<2x128xf32>
      %c0_66 = arith.constant 0 : index
      %c0_67 = arith.constant 0 : index
      %132 = vector.load %arg9[%c0_66, %c0_67] : memref<1x128xf32, #tpu.memory_space<vmem>>, vector<1x128xf32>
      %133 = vector.broadcast %132 : vector<1x128xf32> to vector<2x128xf32>
      %134 = arith.addf %131, %133 : vector<2x128xf32>
      %cst_68 = arith.constant 0.000000e+00 : f32
      %135 = vector.broadcast %cst_68 : f32 to vector<2x128xf32>
      %136 = arith.maximumf %134, %135 : vector<2x128xf32>
      %137 = arith.truncf %136 : vector<2x128xf32> to vector<2x128xbf16>
      %c0_69 = arith.constant 0 : index
      %c0_70 = arith.constant 0 : index
      %138 = vector.load %arg10[%c0_69, %c0_70] : memref<128x128xbf16, #tpu.memory_space<vmem>>, vector<128x128xbf16>
      %cst_71 = arith.constant dense<0.000000e+00> : vector<2x128xf32>
      %139 = tpu.matmul %137, %138, %cst_71 {dimension_numbers = #tpu.dot_dimension_numbers<[1], [0], [0], [1], [0, 0, 1, 1], [], []>} : vector<2x128xbf16>, vector<128x128xbf16>, vector<2x128xf32> -> vector<2x128xf32>
      %cst_72 = arith.constant dense<0.000000e+00> : vector<128xf32>
      %140 = vector.multi_reduction <add>, %139, %cst_72 [0] : vector<2x128xf32> to vector<128xf32>
      %141 = vector.shape_cast %140 : vector<128xf32> to vector<1x128xf32>
      %cst_73 = arith.constant 5.000000e-01 : f32
      %142 = vector.broadcast %cst_73 : f32 to vector<1x128xf32>
      %143 = arith.mulf %141, %142 : vector<1x128xf32>
      %144 = arith.mulf %139, %139 : vector<2x128xf32>
      %cst_74 = arith.constant dense<0.000000e+00> : vector<128xf32>
      %145 = vector.multi_reduction <add>, %144, %cst_74 [0] : vector<2x128xf32> to vector<128xf32>
      %146 = vector.shape_cast %145 : vector<128xf32> to vector<1x128xf32>
      %cst_75 = arith.constant 5.000000e-01 : f32
      %147 = vector.broadcast %cst_75 : f32 to vector<1x128xf32>
      %148 = arith.mulf %146, %147 : vector<1x128xf32>
      %149 = arith.mulf %143, %143 : vector<1x128xf32>
      %150 = arith.subf %148, %149 : vector<1x128xf32>
      %cst_76 = arith.constant 0.000000e+00 : f32
      %151 = vector.broadcast %cst_76 : f32 to vector<1x128xf32>
      %152 = arith.maximumf %150, %151 : vector<1x128xf32>
      %153 = vector.broadcast %143 : vector<1x128xf32> to vector<2x128xf32>
      %154 = arith.subf %139, %153 : vector<2x128xf32>
      %cst_77 = arith.constant 9.99999974E-6 : f32
      %155 = vector.broadcast %cst_77 : f32 to vector<1x128xf32>
      %156 = arith.addf %152, %155 : vector<1x128xf32>
      %157 = math.rsqrt %156 : vector<1x128xf32>
      %158 = vector.broadcast %157 : vector<1x128xf32> to vector<2x128xf32>
      %159 = arith.mulf %154, %158 : vector<2x128xf32>
      %c0_78 = arith.constant 0 : index
      %c0_79 = arith.constant 0 : index
      %160 = vector.load %arg11[%c0_78, %c0_79] : memref<1x128xf32, #tpu.memory_space<vmem>>, vector<1x128xf32>
      %161 = vector.broadcast %160 : vector<1x128xf32> to vector<2x128xf32>
      %162 = arith.mulf %159, %161 : vector<2x128xf32>
      %c0_80 = arith.constant 0 : index
      %c0_81 = arith.constant 0 : index
      %163 = vector.load %arg12[%c0_80, %c0_81] : memref<1x128xf32, #tpu.memory_space<vmem>>, vector<1x128xf32>
      %164 = vector.broadcast %163 : vector<1x128xf32> to vector<2x128xf32>
      %165 = arith.addf %162, %164 : vector<2x128xf32>
      %c0_82 = arith.constant 0 : index
      %c0_83 = arith.constant 0 : index
      %166 = vector.load %arg19[%c0_82, %c0_83] : memref<2x128xf32, #tpu.memory_space<vmem>>, vector<2x128xf32>
      tpu.vector_store %arg19[%c0_82, %c0_83], %165 {strides = array<i32>} : memref<2x128xf32, #tpu.memory_space<vmem>>, vector<2x128xf32>,
      %167 = arith.truncf %165 : vector<2x128xf32> to vector<2x128xbf16>
      %c0_84 = arith.constant 0 : index
      %c0_85 = arith.constant 0 : index
      %168 = vector.load %arg13[%c0_84, %c0_85] : memref<128x128xbf16, #tpu.memory_space<vmem>>, vector<128x128xbf16>
      %cst_86 = arith.constant dense<0.000000e+00> : vector<2x128xf32>
      %169 = tpu.matmul %167, %168, %cst_86 {dimension_numbers = #tpu.dot_dimension_numbers<[1], [0], [0], [1], [0, 0, 1, 1], [], []>} : vector<2x128xbf16>, vector<128x128xbf16>, vector<2x128xf32> -> vector<2x128xf32>
      %cst_87 = arith.constant dense<0.000000e+00> : vector<128xf32>
      %170 = vector.multi_reduction <add>, %169, %cst_87 [0] : vector<2x128xf32> to vector<128xf32>
      %171 = vector.shape_cast %170 : vector<128xf32> to vector<1x128xf32>
      %cst_88 = arith.constant 5.000000e-01 : f32
      %172 = vector.broadcast %cst_88 : f32 to vector<1x128xf32>
      %173 = arith.mulf %171, %172 : vector<1x128xf32>
      %174 = arith.mulf %169, %169 : vector<2x128xf32>
      %cst_89 = arith.constant dense<0.000000e+00> : vector<128xf32>
      %175 = vector.multi_reduction <add>, %174, %cst_89 [0] : vector<2x128xf32> to vector<128xf32>
      %176 = vector.shape_cast %175 : vector<128xf32> to vector<1x128xf32>
      %cst_90 = arith.constant 5.000000e-01 : f32
      %177 = vector.broadcast %cst_90 : f32 to vector<1x128xf32>
      %178 = arith.mulf %176, %177 : vector<1x128xf32>
      %179 = arith.mulf %173, %173 : vector<1x128xf32>
      %180 = arith.subf %178, %179 : vector<1x128xf32>
      %cst_91 = arith.constant 0.000000e+00 : f32
      %181 = vector.broadcast %cst_91 : f32 to vector<1x128xf32>
      %182 = arith.maximumf %180, %181 : vector<1x128xf32>
      %183 = vector.broadcast %173 : vector<1x128xf32> to vector<2x128xf32>
      %184 = arith.subf %169, %183 : vector<2x128xf32>
      %cst_92 = arith.constant 9.99999974E-6 : f32
      %185 = vector.broadcast %cst_92 : f32 to vector<1x128xf32>
      %186 = arith.addf %182, %185 : vector<1x128xf32>
      %187 = math.rsqrt %186 : vector<1x128xf32>
      %188 = vector.broadcast %187 : vector<1x128xf32> to vector<2x128xf32>
      %189 = arith.mulf %184, %188 : vector<2x128xf32>
      %c0_93 = arith.constant 0 : index
      %c0_94 = arith.constant 0 : index
      %190 = vector.load %arg14[%c0_93, %c0_94] : memref<1x128xf32, #tpu.memory_space<vmem>>, vector<1x128xf32>
      %191 = vector.broadcast %190 : vector<1x128xf32> to vector<2x128xf32>
      %192 = arith.mulf %189, %191 : vector<2x128xf32>
      %c0_95 = arith.constant 0 : index
      %c0_96 = arith.constant 0 : index
      %193 = vector.load %arg15[%c0_95, %c0_96] : memref<1x128xf32, #tpu.memory_space<vmem>>, vector<1x128xf32>
      %194 = vector.broadcast %193 : vector<1x128xf32> to vector<2x128xf32>
      %195 = arith.addf %192, %194 : vector<2x128xf32>
      %cst_97 = arith.constant 0.000000e+00 : f32
      %196 = vector.broadcast %cst_97 : f32 to vector<2x128xf32>
      %197 = arith.maximumf %195, %196 : vector<2x128xf32>
      %198 = arith.truncf %197 : vector<2x128xf32> to vector<2x128xbf16>
      %c0_98 = arith.constant 0 : index
      %c0_99 = arith.constant 0 : index
      %199 = vector.load %arg16[%c0_98, %c0_99] : memref<128x128xbf16, #tpu.memory_space<vmem>>, vector<128x128xbf16>
      %cst_100 = arith.constant dense<0.000000e+00> : vector<2x128xf32>
      %200 = tpu.matmul %198, %199, %cst_100 {dimension_numbers = #tpu.dot_dimension_numbers<[1], [0], [0], [1], [0, 0, 1, 1], [], []>} : vector<2x128xbf16>, vector<128x128xbf16>, vector<2x128xf32> -> vector<2x128xf32>
      %c0_101 = arith.constant 0 : index
      %c0_102 = arith.constant 0 : index
      %201 = vector.load %arg17[%c0_101, %c0_102] : memref<1x128xf32, #tpu.memory_space<vmem>>, vector<1x128xf32>
      %202 = vector.broadcast %201 : vector<1x128xf32> to vector<2x128xf32>
      %203 = arith.addf %200, %202 : vector<2x128xf32>
      %c0_103 = arith.constant 0 : index
      %c0_104 = arith.constant 0 : index
      %204 = vector.load %arg20[%c0_103, %c0_104] : memref<2x128xf32, #tpu.memory_space<vmem>>, vector<2x128xf32>
      tpu.vector_store %arg20[%c0_103, %c0_104], %203 {strides = array<i32>} : memref<2x128xf32, #tpu.memory_space<vmem>>, vector<2x128xf32>,
    } else {
    }
    return
  }
  func.func @transform_0(%arg0: i32) -> (i32, i32, i32, i32) {
    %c0_i32 = arith.constant 0 : i32
    %c0_i32_0 = arith.constant 0 : i32
    %c0_i32_1 = arith.constant 0 : i32
    %c0_i32_2 = arith.constant 0 : i32
    return %arg0, %c0_i32, %c0_i32_0, %c0_i32_1 : i32, i32, i32, i32
  }
  func.func @transform_1(%arg0: i32) -> (i32, i32, i32) {
    %c0_i32 = arith.constant 0 : i32
    %c0_i32_0 = arith.constant 0 : i32
    %c0_i32_1 = arith.constant 0 : i32
    %c0_i32_2 = arith.constant 0 : i32
    return %c0_i32, %c0_i32_0, %c0_i32_1 : i32, i32, i32
  }
  func.func @transform_2(%arg0: i32) -> (i32, i32) {
    %c0_i32 = arith.constant 0 : i32
    %c0_i32_0 = arith.constant 0 : i32
    %c0_i32_1 = arith.constant 0 : i32
    return %c0_i32, %c0_i32_0 : i32, i32
  }
  func.func @transform_3(%arg0: i32) -> (i32, i32) {
    %c0_i32 = arith.constant 0 : i32
    %c0_i32_0 = arith.constant 0 : i32
    %c0_i32_1 = arith.constant 0 : i32
    return %c0_i32, %c0_i32_0 : i32, i32
  }
  func.func @transform_4(%arg0: i32) -> (i32, i32) {
    %c0_i32 = arith.constant 0 : i32
    %c0_i32_0 = arith.constant 0 : i32
    %c0_i32_1 = arith.constant 0 : i32
    return %c0_i32, %c0_i32_0 : i32, i32
  }
  func.func @transform_5(%arg0: i32) -> (i32, i32) {
    %c0_i32 = arith.constant 0 : i32
    %c0_i32_0 = arith.constant 0 : i32
    %c0_i32_1 = arith.constant 0 : i32
    return %c0_i32, %c0_i32_0 : i32, i32
  }
  func.func @transform_6(%arg0: i32) -> (i32, i32) {
    %c0_i32 = arith.constant 0 : i32
    %c0_i32_0 = arith.constant 0 : i32
    %c0_i32_1 = arith.constant 0 : i32
    return %c0_i32, %c0_i32_0 : i32, i32
  }
  func.func @transform_7(%arg0: i32) -> (i32, i32) {
    %c0_i32 = arith.constant 0 : i32
    %c0_i32_0 = arith.constant 0 : i32
    %c0_i32_1 = arith.constant 0 : i32
    return %c0_i32, %c0_i32_0 : i32, i32
  }
  func.func @transform_8(%arg0: i32) -> (i32, i32) {
    %c0_i32 = arith.constant 0 : i32
    %c0_i32_0 = arith.constant 0 : i32
    %c0_i32_1 = arith.constant 0 : i32
    return %c0_i32, %c0_i32_0 : i32, i32
  }
  func.func @transform_9(%arg0: i32) -> (i32, i32) {
    %c0_i32 = arith.constant 0 : i32
    %c0_i32_0 = arith.constant 0 : i32
    %c0_i32_1 = arith.constant 0 : i32
    return %c0_i32, %c0_i32_0 : i32, i32
  }
  func.func @transform_10(%arg0: i32) -> (i32, i32) {
    %c0_i32 = arith.constant 0 : i32
    %c0_i32_0 = arith.constant 0 : i32
    %c0_i32_1 = arith.constant 0 : i32
    return %c0_i32, %c0_i32_0 : i32, i32
  }
  func.func @transform_11(%arg0: i32) -> (i32, i32) {
    %c0_i32 = arith.constant 0 : i32
    %c0_i32_0 = arith.constant 0 : i32
    %c0_i32_1 = arith.constant 0 : i32
    return %c0_i32, %c0_i32_0 : i32, i32
  }
  func.func @transform_12(%arg0: i32) -> (i32, i32) {
    %c0_i32 = arith.constant 0 : i32
    %c0_i32_0 = arith.constant 0 : i32
    %c0_i32_1 = arith.constant 0 : i32
    return %c0_i32, %c0_i32_0 : i32, i32
  }
  func.func @transform_13(%arg0: i32) -> (i32, i32) {
    %c0_i32 = arith.constant 0 : i32
    %c0_i32_0 = arith.constant 0 : i32
    %c0_i32_1 = arith.constant 0 : i32
    return %c0_i32, %c0_i32_0 : i32, i32
  }
  func.func @transform_14(%arg0: i32) -> (i32, i32) {
    %c0_i32 = arith.constant 0 : i32
    %c0_i32_0 = arith.constant 0 : i32
    %c0_i32_1 = arith.constant 0 : i32
    return %c0_i32, %c0_i32_0 : i32, i32
  }
  func.func @transform_15(%arg0: i32) -> (i32, i32) {
    %c0_i32 = arith.constant 0 : i32
    %c0_i32_0 = arith.constant 0 : i32
    %c0_i32_1 = arith.constant 0 : i32
    return %c0_i32, %c0_i32_0 : i32, i32
  }
  func.func @transform_16(%arg0: i32) -> (i32, i32) {
    %c0_i32 = arith.constant 0 : i32
    %c0_i32_0 = arith.constant 0 : i32
    %c0_i32_1 = arith.constant 0 : i32
    return %c0_i32, %c0_i32_0 : i32, i32
  }
  func.func @transform_17(%arg0: i32) -> (i32, i32) {
    %c0_i32 = arith.constant 0 : i32
    %c0_i32_0 = arith.constant 0 : i32
    %c0_i32_1 = arith.constant 0 : i32
    return %c0_i32, %c0_i32_0 : i32, i32
  }
  func.func @transform_18(%arg0: i32) -> (i32, i32) {
    %c0_i32 = arith.constant 0 : i32
    %c0_i32_0 = arith.constant 0 : i32
    %c0_i32_1 = arith.constant 0 : i32
    return %c0_i32, %c0_i32_0 : i32, i32
  }
  func.func @transform_19(%arg0: i32) -> (i32, i32) {
    %c0_i32 = arith.constant 0 : i32
    %c0_i32_0 = arith.constant 0 : i32
    %c0_i32_1 = arith.constant 0 : i32
    return %c0_i32, %c0_i32_0 : i32, i32
  }
}

</mosaic_0001>

<bundles_post_ra>
// kernel: tpu_custom_call.1
= control target key start
LH: loop header
LB: loop body
LE: loop exit
PB: predicated region body
PF: predicated region fallthrough
CT: control target
= control target key end

     0   :  { %s6050_s0 = inlined_call_operand.vmem [shape: bf16[2,3,288,4], index: 0, kind: input, shape index: {}]   ;;  %s6051_s1 = inlined_call_operand.vmem [shape: bf16[9,4,128], index: 1, kind: input, shape index: {}]   ;;  %s6052_s2 = inlined_call_operand.vmem [shape: f32[1,128], index: 2, kind: input, shape index: {}]   ;;  %s6053_s3 = inlined_call_operand.vmem [shape: bf16[128,128], index: 3, kind: input, shape index: {}]   ;;  %s6054_s4 = inlined_call_operand.vmem [shape: f32[1,128], index: 4, kind: input, shape index: {}]   ;;  %s6055_s5 = inlined_call_operand.vmem [shape: f32[1,128], index: 5, kind: input, shape index: {}]   ;;  %s6056_s6 = inlined_call_operand.vmem [shape: bf16[128,128], index: 6, kind: input, shape index: {}]   ;;  %s6057_s7 = inlined_call_operand.vmem [shape: f32[1,128], index: 7, kind: input, shape index: {}]   ;;  %s6058_s8 = inlined_call_operand.vmem [shape: f32[1,128], index: 8, kind: input, shape index: {}]   ;;  %s6059_s9 = inlined_call_operand.vmem [shape: bf16[128,128], index: 9, kind: input, shape index: {}]   ;;  %s6060_s10 = inlined_call_operand.vmem [shape: f32[1,128], index: 10, kind: input, shape index: {}]   ;;  %s6061_s11 = inlined_call_operand.vmem [shape: f32[1,128], index: 11, kind: input, shape index: {}]   ;;  %s6062_s12 = inlined_call_operand.vmem [shape: bf16[128,128], index: 12, kind: input, shape index: {}]   ;;  %s6063_s13 = inlined_call_operand.vmem [shape: f32[1,128], index: 13, kind: input, shape index: {}]   ;;  %s6064_s14 = inlined_call_operand.vmem [shape: f32[1,128], index: 14, kind: input, shape index: {}]   ;;  %s6065_s15 = inlined_call_operand.vmem [shape: bf16[128,128], index: 15, kind: input, shape index: {}]   ;;  %s6066_s16 = inlined_call_operand.vmem [shape: f32[1,128], index: 16, kind: input, shape index: {}]   ;;  %s6067_s17 = inlined_call_operand.hbm [shape: f32[2,128], index: 17, kind: output, shape index: {0}]   ;;  %s6068_s18 = inlined_call_operand.hbm [shape: f32[2,128], index: 18, kind: output, shape index: {1}]   ;;  %s6069_s19 = inlined_call_operand.hbm [shape: f32[2,128], index: 19, kind: output, shape index: {2}]  }
   0x1   :  { %6072 = sst [smem:[#allocation9_spill]] %s6050_s0 }
   0x2   :  { %6073 = sst [smem:[#allocation10_spill]] %s6051_s1 }
   0x3   :  { %6074 = sst [smem:[#allocation11_spill]] %s6052_s2 }
   0x4   :  { %6075 = sst [smem:[#allocation12_spill]] %s6053_s3 }
   0x5   :  { %25 = vsyncpa [#allocation3], 0 }
   0x6   :  { %26 = vsyncpa [#allocation5], 0  ;;  %s5238_s0 = smov 0  }
   0x7 LB: > { %s5244_s30 = sadd.s32 4294967295, %s5130_s0   ;;  %p3759_p0 = scmp.ge.s32.totalorder %s5130_s0, 1  ;;  %s5130_s0 = sphi %s5238_s0, %s32_s0  }
   0x8   : > { %p529_p1 = scmp.lt.s32.totalorder %s5130_s0, 3 }
   0xa   : > { %p530_p2 = pnand %p3759_p0, %p529_p1 }
   0xb   : > { %p580_p3 = scmp.lt.s32.totalorder (!%p530_p2), %s5244_s30, 1  ;;  %s6076_s2 = sld [smem:[#allocation9_spill]] (!%p530_p2) }
   0xc   : > { %533 = sbr.rel (%p530_p2) target bundleno = 1877 (0x755), region = 88  ;;  %p3761_p4 = scmp.ne.s32.totalorder (!%p530_p2), %s5244_s30, 0 }
  0x13   : > { %s581_s20 = scalar_select %p580_p3, %s5244_s30, 1 }
  0x14   : > { %589 = sbr.rel (%p3761_p4) target bundleno = 27 (0x1b), region = 92  ;;  %v5132_v0 = vmov (!%p3761_p4), 0.0  }
  0x15   : > { %s4903_s21 = smul.u32 432, %s581_s20  ;;  %590 = vst [vmem:[#allocation2] sm:$0x3] (!%p3761_p4), %v5132_v0  ;;  %591 = vst [vmem:[#allocation4] sm:$0x3] (!%p3761_p4), %v5132_v0 }
  0x16   : > { %592 = vst [vmem:[#allocation6] sm:$0x3] (!%p3761_p4), %v5132_v0 }
  0x17   : > { %s5253_s23 = scalar_lea.vmem %s6076_s2, %s4903_s21 }
  0x1b PF: > { %s6077_s3 = sld [smem:[#allocation10_spill]]  ;;  %vm833_vm0 = vcmask 1041408   ;;  %v4936_v3 = vld [vmem:[%s5253_s23 + $0x90] sm:$0xff]   ;;  %vm784_vm1 = vcmask 31744   ;;  %v4937_v6 = vld [vmem:[%s5253_s23 + $0x98] sm:$0xff]   ;;  %v5282_v8 = vld [vmem:[%s5253_s23 + $0xa0] sm:$0xff]  }
  0x1c   : > { %4231 = vmatprep.mubr.msk.bf16.mxu1 %vm784_vm1, %v4936_v3  ;;  %4367 = vmatprep.mubr.msk.bf16.mxu0 %vm784_vm1, %v4937_v6  ;;  %v5292_v12 = vld [vmem:[%s5253_s23 + $0xa8] sm:$0xff]   ;;  %v5301_v13 = vld [vmem:[%s5253_s23 + $0xb0] sm:$0xff]   ;;  %v5304_v14 = vld [vmem:[%s5253_s23 + $0xb8] sm:$0xff]   ;;  %s6078_s1 = sld [smem:[#allocation11_spill]]  ;;  %s4028_s22 = scalar_lea.vmem [#allocation2], %s5130_s0 }
  0x1d   : > { %v5319_v16 = vld [vmem:[%s5253_s23 + $0xc0] sm:$0xff]   ;;  %v5322_v17 = vld [vmem:[%s5253_s23 + $0xc8] sm:$0xff]   ;;  %v5333_v18 = vld [vmem:[%s5253_s23 + $0xd0] sm:$0xff]   ;;  %p3970_p5 = scmp.ne.s32.totalorder %s5244_s30, 1 }
  0x1e   : > { %v5336_v19 = vld [vmem:[%s5253_s23 + $0x128] sm:$0xff]   ;;  %v5351_v21 = vld [vmem:[%s5253_s23 + $0xd8] sm:$0xff]   ;;  %v5354_v22 = vld [vmem:[%s5253_s23 + $0x130] sm:$0xff]   ;;  %s6079_s25 = sld [smem:[#allocation12_spill]] (!%p3970_p5)  ;;  %vm5134_vm2 = vmmov (!%p3970_p5), 0  }
  0x1f   : > { %v5357_v23 = vld [vmem:[%s5253_s23 + $0xe0] sm:$0xff]   ;;  %v5360_v24 = vld [vmem:[%s5253_s23 + $0x138] sm:$0xff]   ;;  %v5372_v26 = vld [vmem:[%s5253_s23 + $0xe8] sm:$0xff]  }
  0x20   : > { %v5375_v27 = vld [vmem:[%s5253_s23 + $0x140] sm:$0xff]   ;;  %v5378_v28 = vld [vmem:[%s5253_s23 + $0xf0] sm:$0xff]   ;;  %v5381_v29 = vld [vmem:[%s5253_s23 + $0x148] sm:$0xff]  }
  0x21   : > { %v3762_v1 = vld [vmem:[%s6077_s3 + $0x2] sm:$0x3]  ;;  %v5262_v2 = vld [vmem:[%s6077_s3 + $0x8] sm:$0x3]  ;;  %v701_v7 = vld [vmem:[%s6077_s3] sm:$0x3] }
  0x22   : > { %4893 = vmatprep.subr.msk.bf16.mxu1 %vm833_vm0, %v3762_v1  ;;  %4897 = vmatprep.subr.msk.bf16.mxu0 %vm833_vm0, %v5262_v2  ;;  %v835_v4 = vsel %vm833_vm0, %v3762_v1, 0  ;;  %v5271_v5 = vsel %vm833_vm0, %v5262_v2, 0  ;;  %v3896_v9 = vld [vmem:[%s6077_s3 + $0xa] sm:$0x3]  ;;  %v1127_v10 = vsel %vm833_vm0, %v701_v7, 0  ;;  %v5396_v31 = vld [vmem:[%s5253_s23 + $0xf8] sm:$0xff]  }
  0x23   : > { %4230 = vmatpush3.bf16.msra.mxu1 %v835_v4  ;;  %4366 = vmatpush3.bf16.msra.mxu0 %v5271_v5  ;;  %v2039_v11 = vsel %vm833_vm0, %v3896_v9, 0  ;;  %v3914_v15 = vld [vmem:[%s6077_s3 + $0xc] sm:$0x3]  ;;  %v3827_v20 = vld [vmem:[%s6077_s3 + $0x4] sm:$0x3]  ;;  %v5399_v32 = vld [vmem:[%s5253_s23 + $0x150] sm:$0xff]  }
  0x24   : > { %4894 = vmatprep.subr.msk.bf16.mxu1 %vm833_vm0, %v701_v7  ;;  %4899 = vmatprep.subr.msk.bf16.mxu0 %vm833_vm0, %v3896_v9  ;;  %v2245_v25 = vsel %vm833_vm0, %v3914_v15, 0  ;;  %v3932_v30 = vld [vmem:[%s6077_s3 + $0xe] sm:$0x3]  ;;  %v5402_v33 = vld [vmem:[%s5253_s23 + $0x100] sm:$0xff]   ;;  %v5405_v34 = vld [vmem:[%s5253_s23 + $0x158] sm:$0xff]   ;;  %v1421_v41 = vsel %vm833_vm0, %v3827_v20, 0 }
  0x25   : > { %v5416_v35 = vld [vmem:[%s5253_s23 + $0x108] sm:$0xff]   ;;  %v5419_v36 = vld [vmem:[%s5253_s23 + $0x160] sm:$0xff]   ;;  %v5436_v40 = vld [vmem:[%s5253_s23 + $0x170] sm:$0xff]   ;;  %v2451_v58 = vsel %vm833_vm0, %v3932_v30, 0 }
  0x26   : > { %4232 = vmatmul.mubr.msk.bf16.vlgmr.msra.gmra.mrb[0].mxu1 %vm784_vm1, %v4937_v6  ;;  %4368 = vmatmul.mubr.msk.bf16.vlgmr.msra.gmra.mrb[0].mxu0 %vm784_vm1, %v5282_v8  ;;  %v4960_v37 = vld [vmem:[%s5253_s23] sm:$0xff]   ;;  %v5423_v38 = vld [vmem:[%s5253_s23 + $0x168] sm:$0xff]   ;;  %v5440_v42 = vld [vmem:[%s5253_s23 + $0x10] sm:$0xff]  }
  0x27   : > { %4264 = vmatpush3.bf16.msra.mxu1 %v1127_v10  ;;  %4400 = vmatpush3.bf16.msra.mxu0 %v2039_v11  ;;  %v5433_v39 = vld [vmem:[%s5253_s23 + $0x8] sm:$0xff]   ;;  %v5443_v43 = vld [vmem:[%s5253_s23 + $0x178] sm:$0xff]   ;;  %v3860_v44 = vld [vmem:[%s6077_s3 + $0x6] sm:$0x3] }
  0x28   : > { %4235 = vmatprep.mubr.msk.bf16.mxu1 %vm784_vm1, %v5282_v8  ;;  %4371 = vmatprep.mubr.msk.bf16.mxu0 %vm784_vm1, %v5292_v12  ;;  %v5458_v45 = vld [vmem:[%s5253_s23 + $0x18] sm:$0xff]   ;;  %v5461_v46 = vld [vmem:[%s5253_s23 + $0x180] sm:$0xff]   ;;  %v5467_v48 = vld [vmem:[%s5253_s23 + $0x188] sm:$0xff]   ;;  %v1627_v3 = vsel %vm833_vm0, %v3860_v44, 0 }
  0x29   : > { %4900 = vmatprep.subr.msk.bf16.mxu0 %vm833_vm0, %v3914_v15  ;;  %4895 = vmatprep.subr.msk.bf16.mxu1 %vm833_vm0, %v3827_v20  ;;  %v5464_v47 = vld [vmem:[%s5253_s23 + $0x20] sm:$0xff]   ;;  %v5478_v49 = vld [vmem:[%s5253_s23 + $0x28] sm:$0xff]   ;;  %v5481_v50 = vld [vmem:[%s5253_s23 + $0x190] sm:$0xff]  }
  0x2a   : > { %v5484_v51 = vld [vmem:[%s5253_s23 + $0x30] sm:$0xff]   ;;  %v5487_v52 = vld [vmem:[%s5253_s23 + $0x198] sm:$0xff]   ;;  %v5501_v54 = vld [vmem:[%s5253_s23 + $0x1a0] sm:$0xff]  }
  0x2b   : > { %v5498_v53 = vld [vmem:[%s5253_s23 + $0x38] sm:$0xff]   ;;  %v5504_v55 = vld [vmem:[%s5253_s23 + $0x40] sm:$0xff]   ;;  %v5515_v56 = vld [vmem:[%s5253_s23 + $0x48] sm:$0xff]  }
  0x2c   : > { %v5518_v57 = vld [vmem:[%s5253_s23 + $0x50] sm:$0xff]   ;;  %v5534_v60 = vld [vmem:[%s5253_s23 + $0x58] sm:$0xff]   ;;  %v5537_v61 = vld [vmem:[%s5253_s23 + $0x60] sm:$0xff]  }
  0x2d   : > { %v3950_v59 = vld [vmem:[%s6077_s3 + $0x10] sm:$0x3]  ;;  %v5548_v62 = vld [vmem:[%s5253_s23 + $0x68] sm:$0xff]   ;;  %v5562_v0 = vld [vmem:[%s5253_s23 + $0x78] sm:$0xff]  }
  0x2e   : > { %4236 = vmatmul.mubr.msk.bf16.gmra.mrb[4].mxu1 %vm784_vm1, %v5292_v12  ;;  %4372 = vmatmul.mubr.msk.bf16.gmra.mrb[4].mxu0 %vm784_vm1, %v5301_v13  ;;  %v5551_v63 = vld [vmem:[%s5253_s23 + $0x70] sm:$0xff]   ;;  %v4984_v1 = vld [vmem:[%s5253_s23 + $0x120] sm:$0xff]   ;;  %v2657_v6 = vsel %vm833_vm0, %v3950_v59, 0 }
  0x2f   : > { %4239 = vmatprep.mubr.msk.bf16.mxu1 %vm784_vm1, %v5301_v13  ;;  %4375 = vmatprep.mubr.msk.bf16.mxu0 %vm784_vm1, %v5304_v14  ;;  %v4985_v4 = vld [vmem:[%s5253_s23 + $0x80] sm:$0xff]   ;;  %v4987_v7 = vld [vmem:[%s5253_s23 + $0x110] sm:$0xff]  }
  0x36   : > { %4240 = vmatmul.mubr.msk.bf16.gmra.mrb[8].mxu1 %vm784_vm1, %v5304_v14  ;;  %4376 = vmatmul.mubr.msk.bf16.gmra.mrb[8].mxu0 %vm784_vm1, %v5319_v16 }
  0x37   : > { %4243 = vmatprep.mubr.msk.bf16.mxu1 %vm784_vm1, %v5319_v16  ;;  %4379 = vmatprep.mubr.msk.bf16.mxu0 %vm784_vm1, %v5322_v17 }
  0x3e   : > { %4244 = vmatmul.mubr.msk.bf16.gmra.mrb[12].mxu1 %vm784_vm1, %v5322_v17  ;;  %4380 = vmatmul.mubr.msk.bf16.gmra.mrb[12].mxu0 %vm784_vm1, %v5333_v18 }
  0x3f   : > { %4247 = vmatprep.mubr.msk.bf16.mxu1 %vm784_vm1, %v5333_v18  ;;  %4401 = vmatprep.mubr.msk.bf16.mxu0 %vm784_vm1, %v5336_v19 }
  0x46   : > { %4248 = vmatmul.mubr.msk.bf16.gmra.mrb[16].mxu1 %vm784_vm1, %v5351_v21  ;;  %4402 = vmatmul.mubr.msk.bf16.vlgmr.msra.gmra.mrb[0].mxu0 %vm784_vm1, %v5354_v22 }
  0x47   : > { %4251 = vmatprep.mubr.msk.bf16.mxu1 %vm784_vm1, %v5357_v23  ;;  %4434 = vmatpush3.bf16.msra.mxu0 %v2245_v25 }
  0x48   : > { %4405 = vmatprep.mubr.msk.bf16.mxu0 %vm784_vm1, %v5360_v24  ;;  %4901 = vmatprep.subr.msk.bf16.mxu0 %vm833_vm0, %v3932_v30 }
  0x4e   : > { %4252 = vmatmul.mubr.msk.bf16.gmra.mrb[20].mxu1 %vm784_vm1, %v5372_v26  ;;  %4406 = vmatmul.mubr.msk.bf16.gmra.mrb[4].mxu0 %vm784_vm1, %v5375_v27 }
  0x4f   : > { %4255 = vmatprep.mubr.msk.bf16.mxu1 %vm784_vm1, %v5378_v28  ;;  %4409 = vmatprep.mubr.msk.bf16.mxu0 %vm784_vm1, %v5381_v29 }
  0x56   : > { %4256 = vmatmul.mubr.msk.bf16.gmra.mrb[24].mxu1 %vm784_vm1, %v5396_v31  ;;  %4410 = vmatmul.mubr.msk.bf16.gmra.mrb[8].mxu0 %vm784_vm1, %v5399_v32 }
  0x57   : > { %4259 = vmatprep.mubr.msk.bf16.mxu1 %vm784_vm1, %v5402_v33  ;;  %4413 = vmatprep.mubr.msk.bf16.mxu0 %vm784_vm1, %v5405_v34 }
  0x5e   : > { %4260 = vmatmul.mubr.msk.bf16.gmra.mrb[28].mxu1 %vm784_vm1, %v5416_v35  ;;  %4414 = vmatmul.mubr.msk.bf16.gmra.mrb[12].mxu0 %vm784_vm1, %v5419_v36 }
  0x5f   : > { %4265 = vmatprep.mubr.msk.bf16.mxu1 %vm784_vm1, %v4960_v37  ;;  %4417 = vmatprep.mubr.msk.bf16.mxu0 %vm784_vm1, %v5423_v38 }
  0x66   : > { %4266 = vmatmul.mubr.msk.bf16.vlgmr.msra.gmra.mrb[0].mxu1 %vm784_vm1, %v5433_v39  ;;  %4418 = vmatmul.mubr.msk.bf16.gmra.mrb[16].mxu0 %vm784_vm1, %v5436_v40 }
  0x67   : > { %4298 = vmatpush3.bf16.msra.mxu1 %v1421_v41  ;;  %4269 = vmatprep.mubr.msk.bf16.mxu1 %vm784_vm1, %v5440_v42 }
  0x68   : > { %4421 = vmatprep.mubr.msk.bf16.mxu0 %vm784_vm1, %v5443_v43  ;;  %4896 = vmatprep.subr.msk.bf16.mxu1 %vm833_vm0, %v3860_v44 }
  0x6e   : > { %4270 = vmatmul.mubr.msk.bf16.gmra.mrb[4].mxu1 %vm784_vm1, %v5458_v45  ;;  %4422 = vmatmul.mubr.msk.bf16.gmra.mrb[20].mxu0 %vm784_vm1, %v5461_v46 }
  0x6f   : > { %4273 = vmatprep.mubr.msk.bf16.mxu1 %vm784_vm1, %v5464_v47  ;;  %4425 = vmatprep.mubr.msk.bf16.mxu0 %vm784_vm1, %v5467_v48 }
  0x76   : > { %4274 = vmatmul.mubr.msk.bf16.gmra.mrb[8].mxu1 %vm784_vm1, %v5478_v49  ;;  %4426 = vmatmul.mubr.msk.bf16.gmra.mrb[24].mxu0 %vm784_vm1, %v5481_v50 }
  0x77   : > { %4277 = vmatprep.mubr.msk.bf16.mxu1 %vm784_vm1, %v5484_v51  ;;  %4429 = vmatprep.mubr.msk.bf16.mxu0 %vm784_vm1, %v5487_v52 }
  0x7e   : > { %4278 = vmatmul.mubr.msk.bf16.gmra.mrb[12].mxu1 %vm784_vm1, %v5498_v53  ;;  %4430 = vmatmul.mubr.msk.bf16.gmra.mrb[28].mxu0 %vm784_vm1, %v5501_v54 }
  0x7f   : > { %4281 = vmatprep.mubr.msk.bf16.mxu1 %vm784_vm1, %v5504_v55  ;;  %4435 = vmatprep.mubr.msk.bf16.mxu0 %vm784_vm1, %v5440_v42 }
  0x86   : > { %4282 = vmatmul.mubr.msk.bf16.gmra.mrb[16].mxu1 %vm784_vm1, %v5515_v56  ;;  %4436 = vmatmul.mubr.msk.bf16.vlgmr.msra.gmra.mrb[0].mxu0 %vm784_vm1, %v5458_v45 }
  0x87   : > { %4285 = vmatprep.mubr.msk.bf16.mxu1 %vm784_vm1, %v5518_v57  ;;  %4468 = vmatpush3.bf16.msra.mxu0 %v2451_v58 }
  0x88   : > { %4439 = vmatprep.mubr.msk.bf16.mxu0 %vm784_vm1, %v5464_v47  ;;  %4902 = vmatprep.subr.msk.bf16.mxu0 %vm833_vm0, %v3950_v59 }
  0x8e   : > { %4286 = vmatmul.mubr.msk.bf16.gmra.mrb[20].mxu1 %vm784_vm1, %v5534_v60  ;;  %4440 = vmatmul.mubr.msk.bf16.gmra.mrb[4].mxu0 %vm784_vm1, %v5478_v49 }
  0x8f   : > { %4289 = vmatprep.mubr.msk.bf16.mxu1 %vm784_vm1, %v5537_v61  ;;  %4443 = vmatprep.mubr.msk.bf16.mxu0 %vm784_vm1, %v5484_v51 }
  0x96   : > { %4290 = vmatmul.mubr.msk.bf16.gmra.mrb[24].mxu1 %vm784_vm1, %v5548_v62  ;;  %4444 = vmatmul.mubr.msk.bf16.gmra.mrb[8].mxu0 %vm784_vm1, %v5498_v53 }
  0x97   : > { %4293 = vmatprep.mubr.msk.bf16.mxu1 %vm784_vm1, %v5551_v63  ;;  %4447 = vmatprep.mubr.msk.bf16.mxu0 %vm784_vm1, %v5504_v55 }
  0x9e   : > { %4294 = vmatmul.mubr.msk.bf16.gmra.mrb[28].mxu1 %vm784_vm1, %v5562_v0  ;;  %4448 = vmatmul.mubr.msk.bf16.gmra.mrb[12].mxu0 %vm784_vm1, %v5515_v56 }
  0x9f   : > { %4299 = vmatprep.mubr.msk.bf16.mxu1 %vm784_vm1, %v4984_v1  ;;  %4451 = vmatprep.mubr.msk.bf16.mxu0 %vm784_vm1, %v5518_v57 }
  0xa6   : > { %4300 = vmatmul.mubr.msk.bf16.vlgmr.msra.gmra.mrb[0].mxu1 %vm784_vm1, %v5336_v19  ;;  %4452 = vmatmul.mubr.msk.bf16.gmra.mrb[16].mxu0 %vm784_vm1, %v5534_v60 }
  0xa7   : > { %4332 = vmatpush3.bf16.msra.mxu1 %v1627_v3  ;;  %4303 = vmatprep.mubr.msk.bf16.mxu1 %vm784_vm1, %v5354_v22 }
  0xa8   : > { %4455 = vmatprep.mubr.msk.bf16.mxu0 %vm784_vm1, %v5537_v61  ;;  %4898 = vmatprep.subr.msk.bf16.mxu1 %vm833_vm0, %v5262_v2  ;;  %v4986_v2 = vld [vmem:[%s5253_s23 + $0x88] sm:$0xff]  }
  0xae   : > { %4304 = vmatmul.mubr.msk.bf16.gmra.mrb[4].mxu1 %vm784_vm1, %v5360_v24  ;;  %4456 = vmatmul.mubr.msk.bf16.gmra.mrb[20].mxu0 %vm784_vm1, %v5548_v62 }
  0xaf   : > { %4307 = vmatprep.mubr.msk.bf16.mxu1 %vm784_vm1, %v5375_v27  ;;  %4459 = vmatprep.mubr.msk.bf16.mxu0 %vm784_vm1, %v5551_v63 }
  0xb6   : > { %4308 = vmatmul.mubr.msk.bf16.gmra.mrb[8].mxu1 %vm784_vm1, %v5381_v29  ;;  %4460 = vmatmul.mubr.msk.bf16.gmra.mrb[24].mxu0 %vm784_vm1, %v5562_v0 }
  0xb7   : > { %4311 = vmatprep.mubr.msk.bf16.mxu1 %vm784_vm1, %v5399_v32  ;;  %4463 = vmatprep.mubr.msk.bf16.mxu0 %vm784_vm1, %v4985_v4 }
  0xbe   : > { %4312 = vmatmul.mubr.msk.bf16.gmra.mrb[12].mxu1 %vm784_vm1, %v5405_v34  ;;  %4464 = vmatmul.mubr.msk.bf16.gmra.mrb[28].mxu0 %vm784_vm1, %v4986_v2 }
  0xbf   : > { %4315 = vmatprep.mubr.msk.bf16.mxu1 %vm784_vm1, %v5419_v36  ;;  %4469 = vmatprep.mubr.msk.bf16.mxu0 %vm784_vm1, %v5282_v8  ;;  %v4989_v8 = vld [vmem:[%s5253_s23 + $0x1a8] sm:$0xff]  }
  0xc6   : > { %4316 = vmatmul.mubr.msk.bf16.gmra.mrb[16].mxu1 %vm784_vm1, %v5423_v38  ;;  %4470 = vmatmul.mubr.msk.bf16.vlgmr.msra.gmra.mrb[0].mxu0 %vm784_vm1, %v5292_v12 }
  0xc7   : > { %4319 = vmatprep.mubr.msk.bf16.mxu1 %vm784_vm1, %v5436_v40  ;;  %4502 = vmatpush3.bf16.msra.mxu0 %v2657_v6 }
  0xc8   : > { %4473 = vmatprep.mubr.msk.bf16.mxu0 %vm784_vm1, %v5301_v13 }
  0xce   : > { %4320 = vmatmul.mubr.msk.bf16.gmra.mrb[20].mxu1 %vm784_vm1, %v5443_v43  ;;  %4474 = vmatmul.mubr.msk.bf16.gmra.mrb[4].mxu0 %vm784_vm1, %v5304_v14 }
  0xcf   : > { %4323 = vmatprep.mubr.msk.bf16.mxu1 %vm784_vm1, %v5461_v46  ;;  %4477 = vmatprep.mubr.msk.bf16.mxu0 %vm784_vm1, %v5319_v16 }
  0xd6   : > { %4324 = vmatmul.mubr.msk.bf16.gmra.mrb[24].mxu1 %vm784_vm1, %v5467_v48  ;;  %4478 = vmatmul.mubr.msk.bf16.gmra.mrb[8].mxu0 %vm784_vm1, %v5322_v17 }
  0xd7   : > { %4327 = vmatprep.mubr.msk.bf16.mxu1 %vm784_vm1, %v5481_v50  ;;  %4481 = vmatprep.mubr.msk.bf16.mxu0 %vm784_vm1, %v5333_v18 }
  0xde   : > { %4328 = vmatmul.mubr.msk.bf16.gmra.mrb[28].mxu1 %vm784_vm1, %v5487_v52  ;;  %4482 = vmatmul.mubr.msk.bf16.gmra.mrb[12].mxu0 %vm784_vm1, %v5351_v21 }
  0xdf   : > { %4333 = vmatprep.mubr.msk.bf16.mxu1 %vm784_vm1, %v5433_v39  ;;  %4485 = vmatprep.mubr.msk.bf16.mxu0 %vm784_vm1, %v5357_v23 }
  0xe6   : > { %4334 = vmatmul.mubr.msk.bf16.vlgmr.msra.gmra.mrb[0].mxu1 %vm784_vm1, %v5440_v42  ;;  %4486 = vmatmul.mubr.msk.bf16.gmra.mrb[16].mxu0 %vm784_vm1, %v5372_v26 }
  0xe7   : > { %4636 = vmatpush3.bf16.msra.mxu1 %v5271_v5  ;;  %4337 = vmatprep.mubr.msk.bf16.mxu1 %vm784_vm1, %v5458_v45  ;;  %v4988_v5 = vld [vmem:[%s5253_s23 + $0x118] sm:$0xff]  }
  0xe8   : > { %4489 = vmatprep.mubr.msk.bf16.mxu0 %vm784_vm1, %v5378_v28 }
  0xee   : > { %4338 = vmatmul.mubr.msk.bf16.gmra.mrb[4].mxu1 %vm784_vm1, %v5464_v47  ;;  %4490 = vmatmul.mubr.msk.bf16.gmra.mrb[20].mxu0 %vm784_vm1, %v5396_v31 }
  0xef   : > { %4341 = vmatprep.mubr.msk.bf16.mxu1 %vm784_vm1, %v5478_v49  ;;  %4493 = vmatprep.mubr.msk.bf16.mxu0 %vm784_vm1, %v5402_v33 }
  0xf6   : > { %4342 = vmatmul.mubr.msk.bf16.gmra.mrb[8].mxu1 %vm784_vm1, %v5484_v51  ;;  %4494 = vmatmul.mubr.msk.bf16.gmra.mrb[24].mxu0 %vm784_vm1, %v5416_v35 }
  0xf7   : > { %4345 = vmatprep.mubr.msk.bf16.mxu1 %vm784_vm1, %v5498_v53  ;;  %4497 = vmatprep.mubr.msk.bf16.mxu0 %vm784_vm1, %v4987_v7 }
  0xfe   : > { %4346 = vmatmul.mubr.msk.bf16.gmra.mrb[12].mxu1 %vm784_vm1, %v5504_v55  ;;  %4498 = vmatmul.mubr.msk.bf16.gmra.mrb[28].mxu0 %vm784_vm1, %v4988_v5 }
  0xff   : > { %4349 = vmatprep.mubr.msk.bf16.mxu1 %vm784_vm1, %v5515_v56  ;;  %4503 = vmatprep.mubr.msk.bf16.mxu0 %vm784_vm1, %v5354_v22 }
 0x106   : > { %4350 = vmatmul.mubr.msk.bf16.gmra.mrb[16].mxu1 %vm784_vm1, %v5518_v57  ;;  %4504 = vmatmul.mubr.msk.bf16.vlgmr.msra.gmra.mrb[0].mxu0 %vm784_vm1, %v5360_v24 }
 0x107   : > { %4353 = vmatprep.mubr.msk.bf16.mxu1 %vm784_vm1, %v5534_v60  ;;  %4507 = vmatprep.mubr.msk.bf16.mxu0 %vm784_vm1, %v5375_v27  ;;  %v5740_v27 = vld [vmem:[%s6078_s1] ss:$0 sm:$0xff] }
 0x10e   : > { %4354 = vmatmul.mubr.msk.bf16.gmra.mrb[20].mxu1 %vm784_vm1, %v5537_v61  ;;  %4508 = vmatmul.mubr.msk.bf16.gmra.mrb[4].mxu0 %vm784_vm1, %v5381_v29 }
 0x10f   : > { %4357 = vmatprep.mubr.msk.bf16.mxu1 %vm784_vm1, %v5548_v62  ;;  %4511 = vmatprep.mubr.msk.bf16.mxu0 %vm784_vm1, %v5399_v32 }
 0x116   : > { %4358 = vmatmul.mubr.msk.bf16.gmra.mrb[24].mxu1 %vm784_vm1, %v5551_v63  ;;  %4512 = vmatmul.mubr.msk.bf16.gmra.mrb[8].mxu0 %vm784_vm1, %v5405_v34 }
 0x117   : > { %4361 = vmatprep.mubr.msk.bf16.mxu1 %vm784_vm1, %v5562_v0  ;;  %4515 = vmatprep.mubr.msk.bf16.mxu0 %vm784_vm1, %v5419_v36 }
 0x11e   : > { %4362 = vmatmul.mubr.msk.bf16.gmra.mrb[28].mxu1 %vm784_vm1, %v4985_v4  ;;  %4516 = vmatmul.mubr.msk.bf16.gmra.mrb[12].mxu0 %vm784_vm1, %v5423_v38 }
 0x11f   : > { %4383 = vmatprep.mubr.msk.bf16.mxu1 %vm784_vm1, %v5351_v21  ;;  %4519 = vmatprep.mubr.msk.bf16.mxu0 %vm784_vm1, %v5436_v40 }
 0x126   : > { %4384 = vmatmul.mubr.msk.bf16.vlgmr.msra.gmra.mrb[16].mxu1 %vm784_vm1, %v5357_v23  ;;  %4520 = vmatmul.mubr.msk.bf16.gmra.mrb[16].mxu0 %vm784_vm1, %v5443_v43 }
 0x127   : > { %4387 = vmatprep.mubr.msk.bf16.mxu1 %vm784_vm1, %v5372_v26  ;;  %4523 = vmatprep.mubr.msk.bf16.mxu0 %vm784_vm1, %v5461_v46 }
 0x12e   : > { %4388 = vmatmul.mubr.msk.bf16.gmra.mrb[20].mxu1 %vm784_vm1, %v5378_v28  ;;  %4524 = vmatmul.mubr.msk.bf16.gmra.mrb[20].mxu0 %vm784_vm1, %v5467_v48 }
 0x12f   : > { %4391 = vmatprep.mubr.msk.bf16.mxu1 %vm784_vm1, %v5396_v31  ;;  %4527 = vmatprep.mubr.msk.bf16.mxu0 %vm784_vm1, %v5481_v50 }
 0x136   : > { %4392 = vmatmul.mubr.msk.bf16.gmra.mrb[24].mxu1 %vm784_vm1, %v5402_v33  ;;  %4528 = vmatmul.mubr.msk.bf16.gmra.mrb[24].mxu0 %vm784_vm1, %v5487_v52 }
 0x137   : > { %4395 = vmatprep.mubr.msk.bf16.mxu1 %vm784_vm1, %v5416_v35  ;;  %4531 = vmatprep.mubr.msk.bf16.mxu0 %vm784_vm1, %v5501_v54 }
 0x13e   : > { %4396 = vmatmul.mubr.msk.bf16.gmra.mrb[28].mxu1 %vm784_vm1, %v4987_v7  ;;  %4532 = vmatmul.mubr.msk.bf16.gmra.mrb[28].mxu0 %vm784_vm1, %v4989_v8 }
 0x1b9   : > { %v4335_v9 = vpop.f32.mrb[0].mxu1 }
 0x1ba   : > { %v1663_v10 = vpop.f32.mrb[1].mxu1 }
 0x1bb   : > { %v4336_v11 = vpop.f32.mrb[2].mxu1 }
 0x1bc   : > { %v1666_v12 = vpop.f32.mrb[3].mxu1 }
 0x1c1   : > { %v4339_v13 = vpop.f32.mrb[4].mxu1 }
 0x1c2   : > { %v1679_v14 = vpop.f32.mrb[5].mxu1 }
 0x1c3   : > { %v4340_v15 = vpop.f32.mrb[6].mxu1 }
 0x1c4   : > { %v1682_v16 = vpop.f32.mrb[7].mxu1 }
 0x1c9   : > { %v4343_v17 = vpop.f32.mrb[8].mxu1 }
 0x1ca   : > { %v1695_v18 = vpop.f32.mrb[9].mxu1 }
 0x1cb   : > { %v4344_v19 = vpop.f32.mrb[10].mxu1 }
 0x1cc   : > { %v1698_v20 = vpop.f32.mrb[11].mxu1 }
 0x1d1   : > { %v4347_v21 = vpop.f32.mrb[12].mxu1 }
 0x1d2   : > { %v5731_v22 = vpop.f32.mrb[13].mxu1 }
 0x1d3   : > { %v5733_v23 = vpop.f32.mrb[14].mxu1 }
 0x1d4   : > { %v5735_v24 = vpop.f32.mrb[15].mxu1 }
 0x1d9   : > { %v4505_v25 = vpop.f32.mrb[0].mxu0 }
 0x1da   : > { %v4637_v26 = vadd.f32 %v4505_v25, %v4335_v9  ;;  %v2693_v28 = vpop.f32.mrb[1].mxu0 }
 0x1db   : > { %v4638_v29 = vadd.f32 %v2693_v28, %v1663_v10  ;;  %v4506_v30 = vpop.f32.mrb[2].mxu0 }
 0x1dc   : > { %v4639_v31 = vadd.f32 %v4506_v30, %v4336_v11  ;;  %v2696_v32 = vpop.f32.mrb[3].mxu0  ;;  %v2861_v35 = vadd.f32 %v4637_v26, %v5740_v27 }
 0x1dd   : > { %v2859_v33 = vadd.f32 %v4638_v29, %v5740_v27  ;;  %v4640_v34 = vadd.f32 %v2696_v32, %v1666_v12 }
 0x1de   : > { %v2862_v38 = vadd.f32 %v4639_v31, %v5740_v27  ;;  %v2893_v43 = vmax.f32 %v2861_v35, 0.0 }
 0x1df   : > { %v2860_v36 = vadd.f32 %v4640_v34, %v5740_v27  ;;  %v2891_v37 = vmax.f32 %v2859_v33, 0.0 }
 0x1e0   : > { %v2894_v49 = vmax.f32 %v2862_v38, 0.0 }
 0x1e1   : > { %v2892_v39 = vmax.f32 %v2860_v36, 0.0  ;;  %v4509_v40 = vpop.f32.mrb[4].mxu0 }
 0x1e2   : > { %v4641_v41 = vadd.f32 %v4509_v40, %v4339_v13  ;;  %v2709_v42 = vpop.f32.mrb[5].mxu0 }
 0x1e3   : > { %v2923_v44 = vadd.f32 %v2892_v39, %v2891_v37  ;;  %v4642_v45 = vadd.f32 %v2709_v42, %v1679_v14  ;;  %v4510_v46 = vpop.f32.mrb[6].mxu0 }
 0x1e4   : > { %v4643_v47 = vadd.f32 %v4510_v46, %v4340_v15  ;;  %v2712_v48 = vpop.f32.mrb[7].mxu0  ;;  %v2865_v53 = vadd.f32 %v4641_v41, %v5740_v27 }
 0x1e5   : > { %v2924_v50 = vadd.f32 %v2923_v44, %v2893_v43  ;;  %v2863_v51 = vadd.f32 %v4642_v45, %v5740_v27  ;;  %v4644_v52 = vadd.f32 %v2712_v48, %v1682_v16 }
 0x1e6   : > { %v2866_v58 = vadd.f32 %v4643_v47, %v5740_v27  ;;  %v2897_v63 = vmax.f32 %v2865_v53, 0.0 }
 0x1e7   : > { %v2895_v54 = vmax.f32 %v2863_v51, 0.0  ;;  %v2925_v55 = vadd.f32 %v2924_v50, %v2894_v49  ;;  %v2864_v56 = vadd.f32 %v4644_v52, %v5740_v27 }
 0x1e8   : > { %v2898_v6 = vmax.f32 %v2866_v58, 0.0 }
 0x1e9   : > { %v2926_v57 = vadd.f32 %v2925_v55, %v2895_v54  ;;  %v2896_v59 = vmax.f32 %v2864_v56, 0.0  ;;  %v4513_v60 = vpop.f32.mrb[8].mxu0 }
 0x1ea   : > { %v4645_v61 = vadd.f32 %v4513_v60, %v4343_v17  ;;  %v2725_v62 = vpop.f32.mrb[9].mxu0 }
 0x1eb   : > { %v2927_v0 = vadd.f32 %v2926_v57, %v2896_v59  ;;  %v4646_v1 = vadd.f32 %v2725_v62, %v1695_v18  ;;  %v4514_v3 = vpop.f32.mrb[10].mxu0 }
 0x1ec   : > { %v4647_v4 = vadd.f32 %v4514_v3, %v4344_v19  ;;  %v2728_v2 = vpop.f32.mrb[11].mxu0  ;;  %v2869_v9 = vadd.f32 %v4645_v61, %v5740_v27 }
 0x1ed   : > { %v2928_v7 = vadd.f32 %v2927_v0, %v2897_v63  ;;  %v2867_v5 = vadd.f32 %v4646_v1, %v5740_v27  ;;  %v4648_v8 = vadd.f32 %v2728_v2, %v1698_v20 }
 0x1ee   : > { %v2870_v14 = vadd.f32 %v4647_v4, %v5740_v27  ;;  %v2901_v19 = vmax.f32 %v2869_v9, 0.0 }
 0x1ef   : > { %v2899_v10 = vmax.f32 %v2867_v5, 0.0  ;;  %v2929_v11 = vadd.f32 %v2928_v7, %v2898_v6  ;;  %v2868_v12 = vadd.f32 %v4648_v8, %v5740_v27 }
 0x1f0   : > { %v2902_v30 = vmax.f32 %v2870_v14, 0.0 }
 0x1f1   : > { %v2930_v13 = vadd.f32 %v2929_v11, %v2899_v10  ;;  %v2900_v15 = vmax.f32 %v2868_v12, 0.0  ;;  %v4517_v16 = vpop.f32.mrb[12].mxu0 }
 0x1f2   : > { %v4649_v17 = vadd.f32 %v4517_v16, %v4347_v21  ;;  %v2741_v18 = vpop.f32.mrb[13].mxu0 }
 0x1f3   : > { %v2931_v25 = vadd.f32 %v2930_v13, %v2900_v15  ;;  %v4650_v26 = vadd.f32 %v2741_v18, %v5731_v22  ;;  %v4518_v28 = vpop.f32.mrb[14].mxu0 }
 0x1f4   : > { %v4651_v20 = vadd.f32 %v4518_v28, %v5733_v23  ;;  %v2744_v29 = vpop.f32.mrb[15].mxu0  ;;  %v2873_v34 = vadd.f32 %v4649_v17, %v5740_v27 }
 0x1f5   : > { %v2932_v31 = vadd.f32 %v2931_v25, %v2901_v19  ;;  %v2871_v32 = vadd.f32 %v4650_v26, %v5740_v27  ;;  %v4652_v33 = vadd.f32 %v2744_v29, %v5735_v24 }
 0x1f6   : > { %v2874_v22 = vadd.f32 %v4651_v20, %v5740_v27  ;;  %v2905_v44 = vmax.f32 %v2873_v34, 0.0 }
 0x1f7   : > { %v2903_v35 = vmax.f32 %v2871_v32, 0.0  ;;  %v2933_v36 = vadd.f32 %v2932_v31, %v2902_v30  ;;  %v2872_v21 = vadd.f32 %v4652_v33, %v5740_v27 }
 0x1f8   : > { %v2906_v50 = vmax.f32 %v2874_v22, 0.0 }
 0x1f9   : > { %v4385_v37 = vpop.f32.mrb[16].mxu1  ;;  %v2934_v38 = vadd.f32 %v2933_v36, %v2903_v35  ;;  %v2904_v39 = vmax.f32 %v2872_v21, 0.0  ;;  %v4521_v40 = vpop.f32.mrb[16].mxu0 }
 0x1fa   : > { %v1933_v23 = vpop.f32.mrb[17].mxu1  ;;  %v4653_v41 = vadd.f32 %v4521_v40, %v4385_v37  ;;  %v2757_v42 = vpop.f32.mrb[17].mxu0 }
 0x1fb   : > { %v4386_v43 = vpop.f32.mrb[18].mxu1  ;;  %v2935_v45 = vadd.f32 %v2934_v38, %v2904_v39  ;;  %v4654_v46 = vadd.f32 %v2757_v42, %v1933_v23  ;;  %v4522_v24 = vpop.f32.mrb[18].mxu0 }
 0x1fc   : > { %v1936_v47 = vpop.f32.mrb[19].mxu1  ;;  %v4655_v48 = vadd.f32 %v4522_v24, %v4386_v43  ;;  %v2760_v49 = vpop.f32.mrb[19].mxu0  ;;  %v2877_v54 = vadd.f32 %v4653_v41, %v5740_v27 }
 0x1fd   : > { %v2936_v51 = vadd.f32 %v2935_v45, %v2905_v44  ;;  %v2875_v52 = vadd.f32 %v4654_v46, %v5740_v27  ;;  %v4656_v53 = vadd.f32 %v2760_v49, %v1936_v47 }
 0x1fe   : > { %v2878_v60 = vadd.f32 %v4655_v48, %v5740_v27  ;;  %v2909_v4 = vmax.f32 %v2877_v54, 0.0 }
 0x1ff   : > { %v2907_v55 = vmax.f32 %v2875_v52, 0.0  ;;  %v2937_v56 = vadd.f32 %v2936_v51, %v2906_v50  ;;  %v2876_v57 = vadd.f32 %v4656_v53, %v5740_v27 }
 0x200   : > { %v2910_v10 = vmax.f32 %v2878_v60, 0.0 }
 0x201   : > { %v4389_v58 = vpop.f32.mrb[20].mxu1  ;;  %v2938_v59 = vadd.f32 %v2937_v56, %v2907_v55  ;;  %v2908_v61 = vmax.f32 %v2876_v57, 0.0  ;;  %v4525_v62 = vpop.f32.mrb[20].mxu0 }
 0x202   : > { %v1949_v63 = vpop.f32.mrb[21].mxu1  ;;  %v4657_v0 = vadd.f32 %v4525_v62, %v4389_v58  ;;  %v2773_v1 = vpop.f32.mrb[21].mxu0 }
 0x203   : > { %v4390_v3 = vpop.f32.mrb[22].mxu1  ;;  %v2939_v2 = vadd.f32 %v2938_v59, %v2908_v61  ;;  %v4658_v6 = vadd.f32 %v2773_v1, %v1949_v63  ;;  %v4526_v7 = vpop.f32.mrb[22].mxu0 }
 0x204   : > { %v1952_v5 = vpop.f32.mrb[23].mxu1  ;;  %v4659_v8 = vadd.f32 %v4526_v7, %v4390_v3  ;;  %v2776_v9 = vpop.f32.mrb[23].mxu0  ;;  %v2881_v14 = vadd.f32 %v4657_v0, %v5740_v27 }
 0x205   : > { %v2940_v11 = vadd.f32 %v2939_v2, %v2909_v4  ;;  %v2879_v12 = vadd.f32 %v4658_v6, %v5740_v27  ;;  %v4660_v13 = vadd.f32 %v2776_v9, %v1952_v5 }
 0x206   : > { %v2882_v25 = vadd.f32 %v4659_v8, %v5740_v27  ;;  %v2913_v32 = vmax.f32 %v2881_v14, 0.0 }
 0x207   : > { %v2911_v15 = vmax.f32 %v2879_v12, 0.0  ;;  %v2941_v16 = vadd.f32 %v2940_v11, %v2910_v10  ;;  %v2880_v17 = vadd.f32 %v4660_v13, %v5740_v27 }
 0x208   : > { %v2914_v38 = vmax.f32 %v2882_v25, 0.0  ;;  %v4992_v25 = vld [vmem:[%s6079_s25 + $0x10] sm:$0xff] (!%p3970_p5)  }
 0x209   : > { %v4393_v18 = vpop.f32.mrb[24].mxu1  ;;  %v2942_v19 = vadd.f32 %v2941_v16, %v2911_v15  ;;  %v2912_v26 = vmax.f32 %v2880_v17, 0.0  ;;  %v4529_v28 = vpop.f32.mrb[24].mxu0 }
 0x20a   : > { %v1965_v20 = vpop.f32.mrb[25].mxu1  ;;  %v4661_v29 = vadd.f32 %v4529_v28, %v4393_v18  ;;  %v2789_v30 = vpop.f32.mrb[25].mxu0  ;;  %v5133_v18 = vmov (!%p3970_p5), 0.0   ;;  %v4994_v28 = vld [vmem:[%s6079_s25 + $0x20] sm:$0xff] (!%p3970_p5)  }
 0x20b   : > { %v4394_v31 = vpop.f32.mrb[26].mxu1  ;;  %v2943_v33 = vadd.f32 %v2942_v19, %v2912_v26  ;;  %v4662_v34 = vadd.f32 %v2789_v30, %v1965_v20  ;;  %v4530_v35 = vpop.f32.mrb[26].mxu0  ;;  %4535 = vmatprep.subr.bf16.mxu0 (!%p3970_p5), %v5133_v18  ;;  %4555 = vmatprep.subr.bf16.mxu1 (!%p3970_p5), %v5133_v18  ;;  %v4991_v19 = vld [vmem:[%s6079_s25 + $0x8] sm:$0xff] (!%p3970_p5)   ;;  %v4993_v26 = vld [vmem:[%s6079_s25 + $0x18] sm:$0xff] (!%p3970_p5)  }
 0x20c   : > { %v1968_v36 = vpop.f32.mrb[27].mxu1  ;;  %v4663_v21 = vadd.f32 %v4530_v35, %v4394_v31  ;;  %v2792_v37 = vpop.f32.mrb[27].mxu0  ;;  %v2885_v23 = vadd.f32 %v4661_v29, %v5740_v27  ;;  %4551 = vmatprep.mubr.msk.bf16.mxu0 (!%p3970_p5), %vm5134_vm2, %v5133_v18  ;;  %4571 = vmatprep.mubr.msk.bf16.mxu1 (!%p3970_p5), %vm5134_vm2, %v5133_v18  ;;  %v4995_v20 = vld [vmem:[%s6079_s25 + $0x28] sm:$0xff] (!%p3970_p5)   ;;  %v4996_v29 = vld [vmem:[%s6079_s25 + $0x30] sm:$0xff] (!%p3970_p5)   ;;  %v4997_v30 = vld [vmem:[%s6079_s25 + $0x38] sm:$0xff] (!%p3970_p5)  }
 0x20d   : > { %v2944_v22 = vadd.f32 %v2943_v33, %v2913_v32  ;;  %v2883_v39 = vadd.f32 %v4662_v34, %v5740_v27  ;;  %v4664_v40 = vadd.f32 %v2792_v37, %v1968_v36  ;;  %v4998_v33 = vld [vmem:[%s6056_s6] sm:$0xff] (!%p3970_p5)   ;;  %v4999_v34 = vld [vmem:[%s6056_s6 + $0x8] sm:$0xff] (!%p3970_p5)   ;;  %v5000_v35 = vld [vmem:[%s6056_s6 + $0x10] sm:$0xff] (!%p3970_p5)  }
 0x20e   : > { %v2886_v46 = vadd.f32 %v4663_v21, %v5740_v27  ;;  %v2917_v52 = vmax.f32 %v2885_v23, 0.0  ;;  %4556 = vmatpush3.bf16.msra.mxu1 (!%p3970_p5), %v4998_v33  ;;  %v5001_v36 = vld [vmem:[%s6056_s6 + $0x18] sm:$0xff] (!%p3970_p5)   ;;  %v5002_v21 = vld [vmem:[%s6056_s6 + $0x20] sm:$0xff] (!%p3970_p5)   ;;  %v5003_v37 = vld [vmem:[%s6056_s6 + $0x28] sm:$0xff] (!%p3970_p5)  }
 0x20f   : > { %v2915_v41 = vmax.f32 %v2883_v39, 0.0  ;;  %v2945_v42 = vadd.f32 %v2944_v22, %v2914_v38  ;;  %v2884_v43 = vadd.f32 %v4664_v40, %v5740_v27  ;;  %4557 = vmatprep.subr.bf16.mxu1 (!%p3970_p5), %v5133_v18  ;;  %v5004_v38 = vld [vmem:[%s6056_s6 + $0x30] sm:$0xff] (!%p3970_p5)   ;;  %v5005_v22 = vld [vmem:[%s6056_s6 + $0x38] sm:$0xff] (!%p3970_p5)  }
 0x210   : > { %v2918_v59 = vmax.f32 %v2886_v46, 0.0 }
 0x211   : > { %v4397_v44 = vpop.f32.mrb[28].mxu1  ;;  %v2946_v45 = vadd.f32 %v2945_v42, %v2915_v41  ;;  %v2916_v24 = vmax.f32 %v2884_v43, 0.0  ;;  %v4533_v47 = vpop.f32.mrb[28].mxu0 }
 0x212   : > { %v1981_v48 = vpop.f32.mrb[29].mxu1  ;;  %v4665_v49 = vadd.f32 %v4533_v47, %v4397_v44  ;;  %v2805_v50 = vpop.f32.mrb[29].mxu0  ;;  %4558 = vmatpush3.bf16.msra.mxu1 (!%p3970_p5), %v4999_v34 }
 0x213   : > { %v4398_v51 = vpop.f32.mrb[30].mxu1  ;;  %v2947_v53 = vadd.f32 %v2946_v45, %v2916_v24  ;;  %v4666_v54 = vadd.f32 %v2805_v50, %v1981_v48  ;;  %v4534_v55 = vpop.f32.mrb[30].mxu0  ;;  %4559 = vmatprep.subr.bf16.mxu1 (!%p3970_p5), %v5133_v18 }
 0x214   : > { %v1984_v56 = vpop.f32.mrb[31].mxu1  ;;  %v4667_v57 = vadd.f32 %v4534_v55, %v4398_v51  ;;  %v2808_v58 = vpop.f32.mrb[31].mxu0  ;;  %v2889_v63 = vadd.f32 %v4665_v49, %v5740_v27 }
 0x215   : > { %v2948_v60 = vadd.f32 %v2947_v53, %v2917_v52  ;;  %v2887_v61 = vadd.f32 %v4666_v54, %v5740_v27  ;;  %v4668_v62 = vadd.f32 %v2808_v58, %v1984_v56 }
 0x216   : > { %v2890_v2 = vadd.f32 %v4667_v57, %v5740_v27  ;;  %v2921_v7 = vmax.f32 %v2889_v63, 0.0  ;;  %4560 = vmatpush3.bf16.msra.mxu1 (!%p3970_p5), %v5000_v35 }
 0x217   : > { %v2919_v0 = vmax.f32 %v2887_v61, 0.0  ;;  %v2949_v1 = vadd.f32 %v2948_v60, %v2918_v59  ;;  %v2888_v3 = vadd.f32 %v4668_v62, %v5740_v27  ;;  %v4990_v27 = vld [vmem:[%s6079_s25] sm:$0xff] (!%p3970_p5)   ;;  %4561 = vmatprep.subr.bf16.mxu1 (!%p3970_p5), %v5133_v18 }
 0x218   : > { %v2922_v8 = vmax.f32 %v2890_v2, 0.0  ;;  %4536 = vmatpush3.bf16.msra.mxu0 (!%p3970_p5), %v4990_v27 }
 0x219   : > { %v2950_v4 = vadd.f32 %v2949_v1, %v2919_v0  ;;  %v2920_v6 = vmax.f32 %v2888_v3, 0.0  ;;  %4537 = vmatprep.subr.bf16.mxu0 (!%p3970_p5), %v5133_v18  ;;  %v3979_v0 = vld [vmem:[%s6054_s4] ss:$0 sm:$0xff] (!%p3970_p5) }
 0x21a   : > { %4562 = vmatpush3.bf16.msra.mxu1 (!%p3970_p5), %v5001_v36  ;;  %v3980_v3 = vld [vmem:[%s6055_s5] ss:$0 sm:$0xff] (!%p3970_p5) }
 0x21b   : > { %v2951_v5 = vadd.f32 %v2950_v4, %v2920_v6  ;;  %4563 = vmatprep.subr.bf16.mxu1 (!%p3970_p5), %v5133_v18 }
 0x21c   : > { %4538 = vmatpush3.bf16.msra.mxu0 (!%p3970_p5), %v4991_v19 }
 0x21d   : > { %v2952_v9 = vadd.f32 %v2951_v5, %v2921_v7  ;;  %4539 = vmatprep.subr.bf16.mxu0 (!%p3970_p5), %v5133_v18  ;;  %v5006_v5 = vld [vmem:[%s6059_s9] sm:$0xff] (!%p3970_p5)  }
 0x21e   : > { %4564 = vmatpush3.bf16.msra.mxu1 (!%p3970_p5), %v5002_v21 }
 0x21f   : > { %v2953_v10 = vadd.f32 %v2952_v9, %v2922_v8  ;;  %4565 = vmatprep.subr.bf16.mxu1 (!%p3970_p5), %v5133_v18  ;;  %v5007_v8 = vld [vmem:[%s6059_s9 + $0x8] sm:$0xff] (!%p3970_p5)   ;;  %v5008_v9 = vld [vmem:[%s6059_s9 + $0x10] sm:$0xff] (!%p3970_p5)  }
 0x220   : > { %4540 = vmatpush3.bf16.msra.mxu0 (!%p3970_p5), %v4992_v25 }
 0x221   : > { %v2954_v11 = vrot.slane %v2953_v10, 4  ;;  %4541 = vmatprep.subr.bf16.mxu0 (!%p3970_p5), %v5133_v18 }
 0x222   : > { %4566 = vmatpush3.bf16.msra.mxu1 (!%p3970_p5), %v5003_v37 }
 0x223   : > { %v2955_v12 = vadd.f32 %v2954_v11, %v2953_v10  ;;  %4567 = vmatprep.subr.bf16.mxu1 (!%p3970_p5), %v5133_v18  ;;  %v5009_v10 = vld [vmem:[%s6059_s9 + $0x18] sm:$0xff] (!%p3970_p5)   ;;  %v5010_v11 = vld [vmem:[%s6059_s9 + $0x20] sm:$0xff] (!%p3970_p5)  }
 0x224   : > { %4542 = vmatpush3.bf16.msra.mxu0 (!%p3970_p5), %v4993_v26 }
 0x225   : > { %v2956_v13 = vrot.slane %v2955_v12, 2  ;;  %4543 = vmatprep.subr.bf16.mxu0 (!%p3970_p5), %v5133_v18 }
 0x226   : > { %4568 = vmatpush3.bf16.msra.mxu1 (!%p3970_p5), %v5004_v38 }
 0x227   : > { %v2957_v14 = vadd.f32 %v2956_v13, %v2955_v12  ;;  %4569 = vmatprep.subr.bf16.mxu1 (!%p3970_p5), %v5133_v18  ;;  %v5011_v12 = vld [vmem:[%s6059_s9 + $0x28] sm:$0xff] (!%p3970_p5)   ;;  %v5012_v13 = vld [vmem:[%s6059_s9 + $0x30] sm:$0xff] (!%p3970_p5)  }
 0x228   : > { %4544 = vmatpush3.bf16.msra.mxu0 (!%p3970_p5), %v4994_v28 }
 0x229   : > { %v2958_v15 = vrot.slane %v2957_v14, 1  ;;  %2967 = sbr.rel (%p3970_p5) target bundleno = 1806 (0x70e), region = 96  ;;  %4545 = vmatprep.subr.bf16.mxu0 (!%p3970_p5), %v5133_v18 }
 0x22a   : > { %4570 = vmatpush3.bf16.msra.mxu1 (!%p3970_p5), %v5005_v22 }
 0x22b   : > { %v2959_v16 = vadd.f32 %v2958_v15, %v2957_v14  ;;  %4595 = vmatprep.subr.bf16.mxu1 (!%p3970_p5), %v5133_v18  ;;  %v5013_v14 = vld [vmem:[%s6059_s9 + $0x38] sm:$0xff] (!%p3970_p5)  }
 0x22c   : > { %4546 = vmatpush3.bf16.msra.mxu0 (!%p3970_p5), %v4995_v20 }
 0x22d   : > { %v2961_v17 = vmul.f32 0.00390625, %v2959_v16  ;;  %4547 = vmatprep.subr.bf16.mxu0 (!%p3970_p5), %v5133_v18 }
 0x22f   : > { %4030 = vst [vmem:[%s4028_s22 - $0x1] sm:$0x1] %v2961_v17 }
 0x230   : > { %4548 = vmatpush3.bf16.msra.mxu0 %v4996_v29 }
 0x231   : > { %4549 = vmatprep.subr.bf16.mxu0 %v5133_v18 }
 0x234   : > { %4550 = vmatpush3.bf16.msra.mxu0 %v4997_v30 }
 0x235   : > { %4575 = vmatprep.subr.bf16.mxu0 %v5133_v18 }
 0x236   : > { %v2968_v31 = vld [vmem:[#allocation2] sm:$0x3] }
 0x237   : > { %v2969_v32 = vpack.c.bf16 %v2968_v31, %v2968_v31 }
 0x239   : > { %4552 = vmatmul.mubr.bf16.vlgmr.msra.gmra.mrb[0].mxu0 %v2969_v32 }
 0x23a   : > { %4591 = vmatprep.mubr.msk.bf16.mxu0 %vm5134_vm2, %v5133_v18  ;;  %4576 = vmatpush3.bf16.msra.mxu0 %v5006_v5 }
 0x23b   : > { %4577 = vmatprep.subr.bf16.mxu0 %v5133_v18 }
 0x23e   : > { %4578 = vmatpush3.bf16.msra.mxu0 %v5007_v8 }
 0x23f   : > { %4579 = vmatprep.subr.bf16.mxu0 %v5133_v18 }
 0x242   : > { %4580 = vmatpush3.bf16.msra.mxu0 %v5008_v9 }
 0x243   : > { %4581 = vmatprep.subr.bf16.mxu0 %v5133_v18 }
 0x246   : > { %4582 = vmatpush3.bf16.msra.mxu0 %v5009_v10 }
 0x247   : > { %4583 = vmatprep.subr.bf16.mxu0 %v5133_v18 }
 0x24a   : > { %4584 = vmatpush3.bf16.msra.mxu0 %v5010_v11 }
 0x24b   : > { %4585 = vmatprep.subr.bf16.mxu0 %v5133_v18 }
 0x24e   : > { %4586 = vmatpush3.bf16.msra.mxu0 %v5011_v12 }
 0x24f   : > { %4587 = vmatprep.subr.bf16.mxu0 %v5133_v18 }
 0x252   : > { %4588 = vmatpush3.bf16.msra.mxu0 %v5012_v13 }
 0x253   : > { %4589 = vmatprep.subr.bf16.mxu0 %v5133_v18 }
 0x256   : > { %4590 = vmatpush3.bf16.msra.mxu0 %v5013_v14 }
 0x257   : > { %4615 = vmatprep.subr.bf16.mxu0 %v5133_v18 }
 0x30c   : > { %v3068_v39 = vpop.f32.mrb[0].mxu0 }
 0x30d   : > { %v3074_v40 = vsel %vm833_vm0, %v3068_v39, 0.0  ;;  %v3082_v23 = vmul.f32 %v3068_v39, %v3068_v39  ;;  %v4553_v41 = vpop.f32.mrb[1].mxu0 }
 0x30e   : > { %v3075_v42 = vrot.slane %v3074_v40, 4  ;;  %v3071_v43 = vpop.f32.mrb[2].mxu0 }
 0x30f   : > { %v3083_v44 = vsel %vm833_vm0, %v3082_v23, 0.0  ;;  %v4554_v45 = vpop.f32.mrb[3].mxu0 }
 0x310   : > { %v3076_v46 = vadd.f32 %v3075_v42, %v3074_v40  ;;  %v3084_v24 = vrot.slane %v3083_v44, 4 }
 0x312   : > { %v3077_v47 = vrot.slane %v3076_v46, 2  ;;  %v3085_v48 = vadd.f32 %v3084_v24, %v3083_v44  ;;  %v3989_v44 = vld [vmem:[%s6057_s7] ss:$0 sm:$0xff] }
 0x314   : > { %v3078_v49 = vadd.f32 %v3077_v47, %v3076_v46  ;;  %v3086_v50 = vrot.slane %v3085_v48, 2  ;;  %v3990_v46 = vld [vmem:[%s6058_s8] ss:$0 sm:$0xff] }
 0x316   : > { %v3079_v51 = vrot.slane %v3078_v49, 1  ;;  %v3087_v52 = vadd.f32 %v3086_v50, %v3085_v48  ;;  %v5014_v50 = vld [vmem:[%s6062_s12] sm:$0xff]  }
 0x318   : > { %v3080_v53 = vadd.f32 %v3079_v51, %v3078_v49  ;;  %v3088_v54 = vrot.slane %v3087_v52, 1  ;;  %v5015_v51 = vld [vmem:[%s6062_s12 + $0x8] sm:$0xff]  }
 0x31a   : > { %v3081_v55 = vmul.f32 0.5, %v3080_v53  ;;  %v3089_v56 = vadd.f32 %v3088_v54, %v3087_v52  ;;  %v5016_v52 = vld [vmem:[%s6062_s12 + $0x10] sm:$0xff]   ;;  %v5017_v53 = vld [vmem:[%s6062_s12 + $0x18] sm:$0xff]   ;;  %v5018_v54 = vld [vmem:[%s6062_s12 + $0x20] sm:$0xff]  }
 0x31c   : > { %v3090_v57 = vmul.f32 0.5, %v3089_v56  ;;  %v3091_v58 = vmul.f32 %v3081_v55, %v3081_v55  ;;  %v3094_v62 = vsub.f32 %v3068_v39, %v3081_v55  ;;  %v5019_v55 = vld [vmem:[%s6062_s12 + $0x28] sm:$0xff]   ;;  %v5020_v56 = vld [vmem:[%s6062_s12 + $0x30] sm:$0xff]  }
 0x31e   : > { %v3092_v59 = vsub.f32 %v3090_v57, %v3091_v58  ;;  %v5021_v57 = vld [vmem:[%s6062_s12 + $0x38] sm:$0xff]  }
 0x320   : > { %v3093_v60 = vmax.f32 %v3092_v59, 0.0 }
 0x322   : > { %v3095_v61 = vadd.f32 1e-05, %v3093_v60 }
 0x324   : > { %5030 = vrsqrt.f32 %v3095_v61 }
 0x32e   : > { %v5031_v63 = vpop.eup %5030 }
 0x32f   : > { %v3097_v1 = vmul.f32 %v5031_v63, %v3094_v62 }
 0x331   : > { %v3105_v4 = vmul.f32 %v3979_v0, %v3097_v1 }
 0x333   : > { %v3113_v2 = vadd.f32 %v3980_v3, %v3105_v4 }
 0x335   : > { %v3114_v6 = vmax.f32 %v3113_v2, 0.0 }
 0x337   : > { %v3115_v7 = vpack.c.bf16 %v3114_v6, %v3114_v6 }
 0x339   : > { %4572 = vmatmul.mubr.bf16.vlgmr.msra.gmra.mrb[0].mxu1 %v3115_v7 }
 0x33a   : > { %4611 = vmatprep.mubr.msk.bf16.mxu1 %vm5134_vm2, %v5133_v18  ;;  %4596 = vmatpush3.bf16.msra.mxu1 %v5014_v50 }
 0x33b   : > { %4597 = vmatprep.subr.bf16.mxu1 %v5133_v18 }
 0x33e   : > { %4598 = vmatpush3.bf16.msra.mxu1 %v5015_v51 }
 0x33f   : > { %4599 = vmatprep.subr.bf16.mxu1 %v5133_v18 }
 0x342   : > { %4600 = vmatpush3.bf16.msra.mxu1 %v5016_v52 }
 0x343   : > { %4601 = vmatprep.subr.bf16.mxu1 %v5133_v18 }
 0x346   : > { %4602 = vmatpush3.bf16.msra.mxu1 %v5017_v53 }
 0x347   : > { %4603 = vmatprep.subr.bf16.mxu1 %v5133_v18 }
 0x34a   : > { %4604 = vmatpush3.bf16.msra.mxu1 %v5018_v54 }
 0x34b   : > { %4605 = vmatprep.subr.bf16.mxu1 %v5133_v18 }
 0x34e   : > { %4606 = vmatpush3.bf16.msra.mxu1 %v5019_v55 }
 0x34f   : > { %4607 = vmatprep.subr.bf16.mxu1 %v5133_v18 }
 0x352   : > { %4608 = vmatpush3.bf16.msra.mxu1 %v5020_v56 }
 0x353   : > { %4609 = vmatprep.subr.bf16.mxu1 %v5133_v18 }
 0x356   : > { %4610 = vmatpush3.bf16.msra.mxu1 %v5021_v57 }
 0x40c   : > { %v3214_v15 = vpop.f32.mrb[0].mxu1 }
 0x40d   : > { %v3220_v16 = vsel %vm833_vm0, %v3214_v15, 0.0  ;;  %v3228_v17 = vmul.f32 %v3214_v15, %v3214_v15  ;;  %v4573_v27 = vpop.f32.mrb[1].mxu1 }
 0x40e   : > { %v3221_v19 = vrot.slane %v3220_v16, 4  ;;  %v3217_v25 = vpop.f32.mrb[2].mxu1 }
 0x40f   : > { %v3229_v26 = vsel %vm833_vm0, %v3228_v17, 0.0  ;;  %v4574_v28 = vpop.f32.mrb[3].mxu1 }
 0x410   : > { %v3222_v20 = vadd.f32 %v3221_v19, %v3220_v16  ;;  %v3230_v29 = vrot.slane %v3229_v26, 4 }
 0x412   : > { %v3223_v30 = vrot.slane %v3222_v20, 2  ;;  %v3231_v31 = vadd.f32 %v3230_v29, %v3229_v26  ;;  %v3999_v26 = vld [vmem:[%s6060_s10] ss:$0 sm:$0xff] }
 0x414   : > { %v3224_v32 = vadd.f32 %v3223_v30, %v3222_v20  ;;  %v3232_v33 = vrot.slane %v3231_v31, 2  ;;  %v4000_v20 = vld [vmem:[%s6061_s11] ss:$0 sm:$0xff] }
 0x416   : > { %v3225_v34 = vrot.slane %v3224_v32, 1  ;;  %v3233_v35 = vadd.f32 %v3232_v33, %v3231_v31  ;;  %v5023_v33 = vld [vmem:[%s6065_s15 + $0x8] sm:$0xff]  }
 0x418   : > { %v3226_v36 = vadd.f32 %v3225_v34, %v3224_v32  ;;  %v3234_v21 = vrot.slane %v3233_v35, 1  ;;  %v5022_v32 = vld [vmem:[%s6065_s15] sm:$0xff]   ;;  %v5024_v34 = vld [vmem:[%s6065_s15 + $0x10] sm:$0xff]  }
 0x41a   : > { %v3227_v37 = vmul.f32 0.5, %v3226_v36  ;;  %v3235_v38 = vadd.f32 %v3234_v21, %v3233_v35  ;;  %v5025_v35 = vld [vmem:[%s6065_s15 + $0x18] sm:$0xff]   ;;  %v5026_v36 = vld [vmem:[%s6065_s15 + $0x20] sm:$0xff]   ;;  %v5027_v21 = vld [vmem:[%s6065_s15 + $0x28] sm:$0xff]  }
 0x41c   : > { %v3236_v22 = vmul.f32 0.5, %v3235_v38  ;;  %v3237_v39 = vmul.f32 %v3227_v37, %v3227_v37  ;;  %v3240_v42 = vsub.f32 %v3214_v15, %v3227_v37  ;;  %v5028_v37 = vld [vmem:[%s6065_s15 + $0x30] sm:$0xff]   ;;  %v5029_v38 = vld [vmem:[%s6065_s15 + $0x38] sm:$0xff]  }
 0x41e   : > { %v3238_v40 = vsub.f32 %v3236_v22, %v3237_v39 }
 0x420   : > { %v3239_v23 = vmax.f32 %v3238_v40, 0.0 }
 0x422   : > { %v3241_v41 = vadd.f32 1e-05, %v3239_v23 }
 0x424   : > { %5032 = vrsqrt.f32 %v3241_v41 }
 0x42e   : > { %v5033_v43 = vpop.eup %5032 }
 0x42f   : > { %v3243_v45 = vmul.f32 %v5033_v43, %v3240_v42 }
 0x431   : > { %v3251_v24 = vmul.f32 %v3989_v44, %v3243_v45 }
 0x433   : > { %v3259_v47 = vadd.f32 %v3990_v46, %v3251_v24 }
 0x435   : > { %v3260_v48 = vmax.f32 %v3259_v47, 0.0 }
 0x437   : > { %v3261_v49 = vpack.c.bf16 %v3260_v48, %v3260_v48 }
 0x439   : > { %4592 = vmatmul.mubr.bf16.vlgmr.msra.gmra.mrb[4].mxu0 %v3261_v49 }
 0x43a   : > { %4631 = vmatprep.mubr.msk.bf16.mxu0 %vm5134_vm2, %v5133_v18  ;;  %4616 = vmatpush3.bf16.msra.mxu0 %v5022_v32 }
 0x43b   : > { %4617 = vmatprep.subr.bf16.mxu0 %v5133_v18 }
 0x43e   : > { %4618 = vmatpush3.bf16.msra.mxu0 %v5023_v33 }
 0x43f   : > { %4619 = vmatprep.subr.bf16.mxu0 %v5133_v18 }
 0x442   : > { %4620 = vmatpush3.bf16.msra.mxu0 %v5024_v34 }
 0x443   : > { %4621 = vmatprep.subr.bf16.mxu0 %v5133_v18 }
 0x446   : > { %4622 = vmatpush3.bf16.msra.mxu0 %v5025_v35 }
 0x447   : > { %4623 = vmatprep.subr.bf16.mxu0 %v5133_v18 }
 0x44a   : > { %4624 = vmatpush3.bf16.msra.mxu0 %v5026_v36 }
 0x44b   : > { %4625 = vmatprep.subr.bf16.mxu0 %v5133_v18 }
 0x44e   : > { %4626 = vmatpush3.bf16.msra.mxu0 %v5027_v21 }
 0x44f   : > { %4627 = vmatprep.subr.bf16.mxu0 %v5133_v18 }
 0x452   : > { %4628 = vmatpush3.bf16.msra.mxu0 %v5028_v37 }
 0x453   : > { %4629 = vmatprep.subr.bf16.mxu0 %v5133_v18 }
 0x456   : > { %4630 = vmatpush3.bf16.msra.mxu0 %v5029_v38 }
 0x50c   : > { %v3360_v58 = vpop.f32.mrb[4].mxu0 }
 0x50d   : > { %v3366_v59 = vsel %vm833_vm0, %v3360_v58, 0.0  ;;  %v3374_v60 = vmul.f32 %v3360_v58, %v3360_v58  ;;  %v4593_v61 = vpop.f32.mrb[5].mxu0 }
 0x50e   : > { %v3367_v62 = vrot.slane %v3366_v59, 4  ;;  %v3363_v63 = vpop.f32.mrb[6].mxu0 }
 0x50f   : > { %v3375_v0 = vsel %vm833_vm0, %v3374_v60, 0.0  ;;  %v4594_v1 = vpop.f32.mrb[7].mxu0 }
 0x510   : > { %v3368_v3 = vadd.f32 %v3367_v62, %v3366_v59  ;;  %v3376_v4 = vrot.slane %v3375_v0, 4  ;;  %v4009_v62 = vld [vmem:[%s6063_s13] ss:$0 sm:$0xff] }
 0x512   : > { %v3369_v2 = vrot.slane %v3368_v3, 2  ;;  %v3377_v6 = vadd.f32 %v3376_v4, %v3375_v0  ;;  %v4010_v0 = vld [vmem:[%s6064_s14] ss:$0 sm:$0xff] }
 0x514   : > { %v3370_v7 = vadd.f32 %v3369_v2, %v3368_v3  ;;  %v3378_v5 = vrot.slane %v3377_v6, 2 }
 0x516   : > { %v3371_v8 = vrot.slane %v3370_v7, 1  ;;  %v3379_v9 = vadd.f32 %v3378_v5, %v3377_v6  ;;  %v4011_v6 = vld [vmem:[%s6066_s16] ss:$0 sm:$0xff] }
 0x518   : > { %v3372_v10 = vadd.f32 %v3371_v8, %v3370_v7  ;;  %v3380_v11 = vrot.slane %v3379_v9, 1 }
 0x51a   : > { %v3373_v12 = vmul.f32 0.5, %v3372_v10  ;;  %v3381_v13 = vadd.f32 %v3380_v11, %v3379_v9 }
 0x51c   : > { %v3382_v14 = vmul.f32 0.5, %v3381_v13  ;;  %v3383_v15 = vmul.f32 %v3373_v12, %v3373_v12  ;;  %v3386_v19 = vsub.f32 %v3360_v58, %v3373_v12 }
 0x51e   : > { %v3384_v16 = vsub.f32 %v3382_v14, %v3383_v15 }
 0x520   : > { %v3385_v17 = vmax.f32 %v3384_v16, 0.0 }
 0x522   : > { %v3387_v27 = vadd.f32 1e-05, %v3385_v17 }
 0x524   : > { %5034 = vrsqrt.f32 %v3387_v27 }
 0x52e   : > { %v5035_v25 = vpop.eup %5034 }
 0x52f   : > { %v3389_v28 = vmul.f32 %v5035_v25, %v3386_v19 }
 0x531   : > { %v3397_v29 = vmul.f32 %v3999_v26, %v3389_v28 }
 0x533   : > { %v3405_v30 = vadd.f32 %v4000_v20, %v3397_v29 }
 0x535   : > { %3406 = vst [vmem:[#allocation4] sm:$0x3] %v3405_v30  ;;  %v3407_v31 = vpack.c.bf16 %v3405_v30, %v3405_v30 }
 0x537   : > { %4612 = vmatmul.mubr.bf16.vlgmr.msra.gmra.mrb[4].mxu1 %v3407_v31 }
 0x60a   : > { %v3506_v22 = vpop.f32.mrb[4].mxu1 }
 0x60b   : > { %v3512_v39 = vsel %vm833_vm0, %v3506_v22, 0.0  ;;  %v3520_v40 = vmul.f32 %v3506_v22, %v3506_v22  ;;  %v4613_v23 = vpop.f32.mrb[5].mxu1 }
 0x60c   : > { %v3513_v41 = vrot.slane %v3512_v39, 4  ;;  %v3509_v42 = vpop.f32.mrb[6].mxu1 }
 0x60d   : > { %v3521_v43 = vsel %vm833_vm0, %v3520_v40, 0.0  ;;  %v4614_v44 = vpop.f32.mrb[7].mxu1 }
 0x60e   : > { %v3514_v45 = vadd.f32 %v3513_v41, %v3512_v39  ;;  %v3522_v46 = vrot.slane %v3521_v43, 4 }
 0x610   : > { %v3515_v24 = vrot.slane %v3514_v45, 2  ;;  %v3523_v47 = vadd.f32 %v3522_v46, %v3521_v43 }
 0x612   : > { %v3516_v48 = vadd.f32 %v3515_v24, %v3514_v45  ;;  %v3524_v49 = vrot.slane %v3523_v47, 2 }
 0x614   : > { %v3517_v50 = vrot.slane %v3516_v48, 1  ;;  %v3525_v51 = vadd.f32 %v3524_v49, %v3523_v47 }
 0x616   : > { %v3518_v18 = vadd.f32 %v3517_v50, %v3516_v48  ;;  %v3526_v52 = vrot.slane %v3525_v51, 1 }
 0x618   : > { %v3519_v53 = vmul.f32 0.5, %v3518_v18  ;;  %v3527_v54 = vadd.f32 %v3526_v52, %v3525_v51 }
 0x61a   : > { %v3528_v55 = vmul.f32 0.5, %v3527_v54  ;;  %v3529_v56 = vmul.f32 %v3519_v53, %v3519_v53  ;;  %v3532_v60 = vsub.f32 %v3506_v22, %v3519_v53 }
 0x61c   : > { %v3530_v57 = vsub.f32 %v3528_v55, %v3529_v56 }
 0x61e   : > { %v3531_v58 = vmax.f32 %v3530_v57, 0.0 }
 0x620   : > { %v3533_v59 = vadd.f32 1e-05, %v3531_v58 }
 0x622   : > { %5036 = vrsqrt.f32 %v3533_v59 }
 0x62c   : > { %v5037_v61 = vpop.eup %5036 }
 0x62d   : > { %v3535_v63 = vmul.f32 %v5037_v61, %v3532_v60 }
 0x62f   : > { %v3543_v1 = vmul.f32 %v4009_v62, %v3535_v63 }
 0x631   : > { %v3551_v3 = vadd.f32 %v4010_v0, %v3543_v1 }
 0x633   : > { %v3552_v4 = vmax.f32 %v3551_v3, 0.0 }
 0x635   : > { %v3553_v2 = vpack.c.bf16 %v3552_v4, %v3552_v4 }
 0x637   : > { %4632 = vmatmul.mubr.bf16.vlgmr.msra.gmra.mrb[8].mxu0 %v3553_v2 }
 0x70a   : > { %v3659_v7 = vpop.f32.mrb[8].mxu0 }
 0x70b   : > { %v3660_v5 = vadd.f32 %v4011_v6, %v3659_v7  ;;  %v4633_v8 = vpop.f32.mrb[9].mxu0 }
 0x70c   : > { %v3662_v9 = vpop.f32.mrb[10].mxu0 }
 0x70d   : > { %3665 = vst [vmem:[#allocation6] sm:$0x3] %v3660_v5  ;;  %v4634_v10 = vpop.f32.mrb[11].mxu0 }
 0x70e PF: > { %p4916_p6 = scmp.eq.s32.totalorder %s5244_s30, 1  ;;  %s5135_s22 = smov [#allocation4]  }
 0x70f   : > { %s3684_s2 = sshll.u32 %s5135_s22, 4  ;;  %s5136_s24 = smov [#allocation2]   ;;  %s3685_s2 = int_to_ptr.vmem [resolvable:$true] %s3684_s2 }
 0x710   : > { %s3673_s26 = sshll.u32 %s5136_s24, 4  ;;  %s5038_s27 = scalar_lea.vmem %s3685_s2, 32  ;;  %s3674_s26 = int_to_ptr.vmem [resolvable:$true] %s3673_s26 }
 0x711   : > { %p5039_p7 = scmp.ne.s32.totalorder %s3685_s2, %s5038_s27  ;;  %p5045_p10 = scmp.lt.s32.totalorder %s3685_s2, %s3685_s2 }
 0x712   : > { %p5046_p11 = scmp.lt.s32.totalorder %s5038_s27, %s5038_s27 }
 0x713   : > { %p5040_p8 = pnand %p5039_p7, %p4916_p6 }
 0x714   : > { %p5047_p12 = por %p5046_p11, %p5045_p10 }
 0x715   : > { %p5041_p9 = pneg %p5040_p8 }
 0x717   : > { %p5048_p13 = pnand %p5047_p12, %p5041_p9 }
 0x719   : > { %5051 = shalt.err (!%p5048_p13)
}
 0x71a   : > { %s5052_s20 = scalar_lea.hbm %s6068_s18, 32 }
 0x71b   : > { %p5053_p0 = scmp.ne.s32.totalorder %s6068_s18, %s5052_s20  ;;  %p5058_p3 = scmp.lt.u32.totalorder %s5052_s20, %s6068_s18 }
 0x71d   : > { %p5054_p1 = pnand %p5053_p0, %p4916_p6 }
 0x71f   : > { %p5055_p2 = pneg %p5054_p1 }
 0x721   : > { %p5060_p4 = pnand %p5058_p3, %p5055_p2 }
 0x723   : > { %5063 = shalt.err (!%p5060_p4)
}
 0x724   : > { %4907 = dma.vmem_to_hbm [thread:$0]  (%p4916_p6), %s3685_s2, 32, %s6068_s18, [#allocation5]  }
 0x725   : > { %s5064_s28 = scalar_lea.vmem %s3674_s26, 32  ;;  %p5071_p9 = scmp.lt.s32.totalorder %s3674_s26, %s3674_s26 }
 0x726   : > { %p5065_p5 = scmp.ne.s32.totalorder %s3674_s26, %s5064_s28  ;;  %p5072_p10 = scmp.lt.s32.totalorder %s5064_s28, %s5064_s28 }
 0x728   : > { %p5066_p7 = pnand %p5065_p5, %p4916_p6  ;;  %p5073_p11 = por %p5072_p10, %p5071_p9 }
 0x72a   : > { %p5067_p8 = pneg %p5066_p7 }
 0x72c   : > { %p5074_p12 = pnand %p5073_p11, %p5067_p8 }
 0x72e   : > { %5077 = shalt.err (!%p5074_p12)
}
 0x72f   : > { %s5078_s23 = scalar_lea.hbm %s6067_s17, 32 }
 0x730   : > { %p5079_p13 = scmp.ne.s32.totalorder %s6067_s17, %s5078_s23  ;;  %p5084_p2 = scmp.lt.u32.totalorder %s5078_s23, %s6067_s17 }
 0x732   : > { %p5080_p0 = pnand %p5079_p13, %p4916_p6 }
 0x734   : > { %p5081_p1 = pneg %p5080_p0 }
 0x736   : > { %p5086_p3 = pnand %p5084_p2, %p5081_p1 }
 0x738   : > { %5089 = shalt.err (!%p5086_p3)
}
 0x739   : > { %4905 = dma.vmem_to_hbm [thread:$0]  (%p4916_p6), %s3674_s26, 32, %s6067_s17, [#allocation3]  }
 0x73a   : > { %s5137_s28 = smov [#allocation6]  }
 0x73b   : > { %s3695_s29 = sshll.u32 %s5137_s28, 4  ;;  %s3696_s29 = int_to_ptr.vmem [resolvable:$true] %s3695_s29 }
 0x73c   : > { %s5090_s20 = scalar_lea.vmem %s3696_s29, 32  ;;  %p5097_p8 = scmp.lt.s32.totalorder %s3696_s29, %s3696_s29 }
 0x73d   : > { %p5091_p4 = scmp.ne.s32.totalorder %s3696_s29, %s5090_s20  ;;  %p5098_p9 = scmp.lt.s32.totalorder %s5090_s20, %s5090_s20 }
 0x73f   : > { %p5092_p5 = pnand %p5091_p4, %p4916_p6  ;;  %p5099_p10 = por %p5098_p9, %p5097_p8 }
 0x741   : > { %p5093_p7 = pneg %p5092_p5 }
 0x743   : > { %p5100_p11 = pnand %p5099_p10, %p5093_p7 }
 0x745   : > { %5103 = shalt.err (!%p5100_p11)
}
 0x746   : > { %s5104_s1 = scalar_lea.hbm %s6069_s19, 32 }
 0x747   : > { %p5105_p12 = scmp.ne.s32.totalorder %s6069_s19, %s5104_s1  ;;  %p5110_p1 = scmp.lt.u32.totalorder %s5104_s1, %s6069_s19 }
 0x749   : > { %p5106_p13 = pnand %p5105_p12, %p4916_p6 }
 0x74b   : > { %p5107_p0 = pneg %p5106_p13 }
 0x74d   : > { %p5112_p2 = pnand %p5110_p1, %p5107_p0 }
 0x74f   : > { %5115 = shalt.err (!%p5112_p2)
}
 0x750   : > { %4909 = dma.vmem_to_hbm [thread:$0]  (%p4916_p6), %s3696_s29, 32, %s6069_s19, [#allocation5]  }
 0x751   : > { %5121 = dma.done.wait (%p4916_p6), [#allocation3], 32  }
 0x752   : > { %5123 = vsyncadd (%p4916_p6), [#allocation3], 4294967264 }
 0x753   : > { %5125 = dma.done.wait (%p4916_p6), [#allocation5], 64  }
 0x754   : > { %5127 = vsyncadd (%p4916_p6), [#allocation5], 4294967232 }
 0x755 PF: > { %s32_s0 = sadd.s32 1, %s5130_s0  }
 0x756   : > { %p29_p3 = scmp.ge.s32.totalorder %s32_s0, 4  }
 0x758   :  { %31 = sbr.rel (!%p29_p3) target bundleno = 7 (0x7), region = 148 }
 0x75f   :  { %3716 = vsyncpa [#allocation3], 1 }
 0x760   :  { %3718 = vsyncpa [#allocation3 + $0x1], 1 }
 0x761   :  { %3719 = vsyncpa [#allocation5], 1 }

</bundles_post_ra>
